<compile_context>
chip_gen: v5e
topology: v5e:2x2
jax: 0.10.0
libtpu: 0.0.40
codegen_flags: <defaults>
</compile_context>

<pallas_src>
import functools

import jax
import jax.numpy as jnp
import numpy as np
from jax.experimental import pallas as pl
from jax.experimental.pallas import tpu as pltpu

H_DIM = 32            # model_args['h_dim']
Q_INPUT_DIM = 7       # dq1, dq2, dp1, dp2, m, length, k
P_INPUT_DIM = 7
N_DENSE = 5
FUSED_W = 2 * H_DIM   # 64: q head rows/cols [0:32), p head rows/cols [32:64)
IN0 = Q_INPUT_DIM + 1  # 8 = 7 features + constant-1 row (folds layer-0 bias)
LANE = 128

# Packed parameter slab layout (weights transposed to (out, in)):
#   rows   0.. 63 : layer 0  W^T (64, 7) in cols 0:7, folded bias in col 7
#   rows  64..127 : layer 1  block-diag W^T (64, 64) in cols 0:64, bias col 64
#   rows 128..191 : layer 2  "
#   rows 192..255 : layer 3  "
#   rows 256..319 : layer 4  rows 0/1 = q/p head weights (cols 0:64), bias col 64
SLAB_COLS = 128
BIAS_COL = FUSED_W                       # column 64
LAYER_ROW_OFF = (0, 64, 128, 192, 256)
SLAB_ROWS = 320


def _round_up(x, m):
    return (x + m - 1) // m * m


# ---------------------------------------------------------------------------
# Kernel
# ---------------------------------------------------------------------------
def spring_mass_kernel(x_ref, w_ref, o_ref, *, approx_sigmoid, precision):
    """Fused q/p MLP with batch in lanes.

    x_ref : (8, tb)            feature rows 0..6, row 7 == 1.0 (bias fold)
    w_ref : (320, 128)         packed parameter slab (resident across steps)
    o_ref : (2, tb)            row 0 = hq, row 1 = hp
    """
    f32 = jnp.float32
    cdt = w_ref.dtype  # compute dtype for MXU operands (f32 or bf16)

    def dot(w, h):
        return jnp.dot(w, h.astype(cdt), preferred_element_type=f32,
                       precision=precision)

    def sigmoid(h):
        # exp and reciprocal both on the EUP slot; exact reciprocal on the
        # accurate (f32) path, approx on the bf16 fast path.
        return pl.reciprocal(1.0 + jnp.exp(-h), approx=approx_sigmoid)

    # Layer 0: bias folded via the constant-1 input row.
    off = LAYER_ROW_OFF[0]
    h = dot(w_ref[off:off + FUSED_W, 0:IN0], x_ref[...])          # (64, tb)
    h = sigmoid(h)

    # Hidden layers 1..3: block-diagonal fused q/p weights + bias column.
    for off in LAYER_ROW_OFF[1:N_DENSE - 1]:
        w = w_ref[off:off + FUSED_W, 0:FUSED_W]
        b = w_ref[off:off + FUSED_W, BIAS_COL:BIAS_COL + 1].astype(f32)
        h = dot(w, h) + b
        h = sigmoid(h)

    # Layer 4: no activation (activate_last=False); rows 0/1 are the q/p heads,
    # rows 2..63 are zero padding.
    off = LAYER_ROW_OFF[N_DENSE - 1]
    w = w_ref[off:off + FUSED_W, 0:FUSED_W]
    b = w_ref[off:off + FUSED_W, BIAS_COL:BIAS_COL + 1].astype(f32)
    out = dot(w, h) + b                                            # (64, tb)
    o_ref[...] = out[0:2, :].astype(o_ref.dtype)


# ---------------------------------------------------------------------------
# Host-side parameter init / packing
# ---------------------------------------------------------------------------
def init_ndense_params(key, in_dim, h_dim, out_dim, n_dense):
    """Init mimicking torch.nn.Linear (U(-1/sqrt(fan_in), +1/sqrt(fan_in)))."""
    dims = [in_dim] + [h_dim] * (n_dense - 1) + [out_dim]
    params = []
    for i in range(n_dense):
        fan_in, fan_out = dims[i], dims[i + 1]
        key, kw, kb = jax.random.split(key, 3)
        bound = 1.0 / np.sqrt(fan_in)
        # stored as (in, out) — transposed vs. torch's (out, in)
        w = jax.random.uniform(kw, (fan_in, fan_out), jnp.float32, -bound, bound)
        b = jax.random.uniform(kb, (1, fan_out), jnp.float32, -bound, bound)
        params += [w, b]
    return params, key


def pack_params(q_params, p_params, dtype=jnp.bfloat16):
    """Fuse both NDenseBlocks into one transposed (320, 128) parameter slab."""
    slab = np.zeros((SLAB_ROWS, SLAB_COLS), np.float32)
    for li in range(N_DENSE):
        wq = np.asarray(q_params[2 * li], np.float32)
        bq = np.asarray(q_params[2 * li + 1], np.float32)
        wp = np.asarray(p_params[2 * li], np.float32)
        bp = np.asarray(p_params[2 * li + 1], np.float32)
        off = LAYER_ROW_OFF[li]
        if li == 0:
            slab[off:off + H_DIM, 0:Q_INPUT_DIM] = wq.T
            slab[off + H_DIM:off + FUSED_W, 0:P_INPUT_DIM] = wp.T
            slab[off:off + H_DIM, Q_INPUT_DIM] = bq[0]            # folded bias
            slab[off + H_DIM:off + FUSED_W, P_INPUT_DIM] = bp[0]
        elif li < N_DENSE - 1:
            slab[off:off + H_DIM, 0:H_DIM] = wq.T                 # block diag
            slab[off + H_DIM:off + FUSED_W, H_DIM:FUSED_W] = wp.T
            slab[off:off + H_DIM, BIAS_COL] = bq[0]
            slab[off + H_DIM:off + FUSED_W, BIAS_COL] = bp[0]
        else:
            slab[off + 0, 0:H_DIM] = wq[:, 0]                     # hq head
            slab[off + 1, H_DIM:FUSED_W] = wp[:, 0]               # hp head
            slab[off + 0, BIAS_COL] = bq[0, 0]
            slab[off + 1, BIAS_COL] = bp[0, 0]
    return jnp.asarray(slab, dtype)


# ---------------------------------------------------------------------------
# Forward wrapper
# ---------------------------------------------------------------------------
def spring_mass_forward(dq1, dq2, dp1, dp2, m, t, dt, length, k,
                        packed_params, *, block_b=2048):
    """Returns (hq, hp) with shape (B, 1) each. t, dt accepted but unused."""
    del t, dt  # matches the PyTorch forward signature
    batch = dq1.shape[0]

    # Lane-dense (8, B) input: one row per scalar feature + a constant-1 row.
    # Each (B,1) -> (1,B) is a pure reshape; the axis-0 concat is one dense pass.
    feats = (dq1, dq2, dp1, dp2, m, length, k)
    rows = [jnp.reshape(f.astype(jnp.float32), (1, batch)) for f in feats]
    rows.append(jnp.ones((1, batch), jnp.float32))
    x = jnp.concatenate(rows, axis=0)                              # (8, B)

    padded = _round_up(batch, LANE)
    tb = max(LANE, (min(block_b, padded) // LANE) * LANE)
    # Keep >= 2 grid steps when the batch allows it (megacore / v7x dual-TC).
    if padded // tb < 2 and padded >= 2 * LANE:
        tb = max(LANE, _round_up(padded // 2, LANE))
    padded = _round_up(padded, tb)
    if padded != batch:
        x = jnp.pad(x, ((0, 0), (0, padded - batch)))

    # bf16 slab -> fast MXU path (approx EUP reciprocal); f32 slab -> accurate
    # path with full-precision f32 matmuls for tight correctness checks.
    fast = packed_params.dtype != jnp.float32
    precision = (jax.lax.Precision.DEFAULT if fast
                 else jax.lax.Precision.HIGHEST)

    out = pl.pallas_call(
        functools.partial(spring_mass_kernel,
                          approx_sigmoid=fast, precision=precision),
        out_shape=jax.ShapeDtypeStruct((2, padded), jnp.float32),
        grid=(padded // tb,),
        in_specs=[
            pl.BlockSpec((IN0, tb), lambda i: (0, i)),
            # constant index map -> weight slab stays resident in VMEM
            pl.BlockSpec((SLAB_ROWS, SLAB_COLS), lambda i: (0, 0)),
        ],
        out_specs=pl.BlockSpec((2, tb), lambda i: (0, i)),
        compiler_params=pltpu.CompilerParams(
            dimension_semantics=("parallel",)),
    )(x, packed_params)

    hq = out[0, :batch].reshape(batch, 1)
    hp = out[1, :batch].reshape(batch, 1)
    return hq, hp


# ---------------------------------------------------------------------------
# Reference (pure numpy, un-fused) for correctness check
# ---------------------------------------------------------------------------
def _ref_mlp(x, params):
    h = np.asarray(x, np.float32)
    n = len(params) // 2
    for i in range(n):
        w = np.asarray(params[2 * i], np.float32)
        b = np.asarray(params[2 * i + 1], np.float32)
        h = h @ w + b
        if i < n - 1:
            h = 1.0 / (1.0 + np.exp(-h))
    return h


def _make_inputs(key, batch):
    keys = jax.random.split(key, 7)
    dq1 = jax.random.normal(keys[0], (batch, 1), jnp.float32)
    dq2 = jax.random.normal(keys[1], (batch, 1), jnp.float32)
    dp1 = jax.random.normal(keys[2], (batch, 1), jnp.float32)
    dp2 = jax.random.normal(keys[3], (batch, 1), jnp.float32)
    m = jax.random.uniform(keys[4], (batch, 1), jnp.float32, 0.5, 2.0)
    length = jax.random.uniform(keys[5], (batch, 1), jnp.float32, 0.5, 2.0)
    k = jax.random.uniform(keys[6], (batch, 1), jnp.float32, 0.5, 2.0)
    t = jnp.zeros((batch, 1), jnp.float32)
    dt = jnp.full((batch, 1), 0.01, jnp.float32)
    return dq1, dq2, dp1, dp2, m, t, dt, length, k


def _features_np(args):
    # [dq1, dq2, dp1, dp2, m, length, k]
    idx = (0, 1, 2, 3, 4, 7, 8)
    return np.concatenate([np.asarray(args[i]) for i in idx], axis=-1)


if __name__ == "__main__":
    key = jax.random.PRNGKey(0)

    # Parameters for model_q and model_p (NDenseBlock: 7->32->32->32->32->1).
    q_params, key = init_ndense_params(key, Q_INPUT_DIM, H_DIM, 1, N_DENSE)
    p_params, key = init_ndense_params(key, P_INPUT_DIM, H_DIM, 1, N_DENSE)
    slab_f32 = pack_params(q_params, p_params, dtype=jnp.float32)
    slab_bf16 = pack_params(q_params, p_params, dtype=jnp.bfloat16)

    # --- (1) small batch, f32 accurate path, tight tolerance ------------------
    key, k1 = jax.random.split(key)
    batch = 8
    args = _make_inputs(k1, batch)
    hq, hp = spring_mass_forward(*args, slab_f32)
    jax.block_until_ready((hq, hp))

    x_np = _features_np(args)
    hq_ref = _ref_mlp(x_np, q_params)
    hp_ref = _ref_mlp(x_np, p_params)
    assert hq.shape == (batch, 1) and hp.shape == (batch, 1)
    # precision=HIGHEST f32 matmuls + exact reciprocal: tight tolerance that
    # would catch any slab-packing / head-swap mistake.
    assert np.allclose(np.asarray(hq), hq_ref, atol=2e-3, rtol=2e-3)
    assert np.allclose(np.asarray(hp), hp_ref, atol=2e-3, rtol=2e-3)

    # --- (2) larger batch (>=2 grid steps), bf16 MXU fast path ----------------
    key, k2 = jax.random.split(key)
    batch2 = 300
    args2 = _make_inputs(k2, batch2)
    hq2, hp2 = spring_mass_forward(*args2, slab_bf16)
    jax.block_until_ready((hq2, hp2))

    x2_np = _features_np(args2)
    assert hq2.shape == (batch2, 1) and hp2.shape == (batch2, 1)
    assert np.allclose(np.asarray(hq2), _ref_mlp(x2_np, q_params),
                       atol=2e-2, rtol=2e-2)
    assert np.allclose(np.asarray(hp2), _ref_mlp(x2_np, p_params),
                       atol=2e-2, rtol=2e-2)

    print("KERNEL_OK")
</pallas_src>

<mosaic_0001>
module attributes {stable_mosaic.version = 11 : i64} {
  func.func @spring_mass_kernel(%arg0: i32, %arg1: memref<8x128xf32, #tpu.memory_space<vmem>>, %arg2: memref<320x128xf32, #tpu.memory_space<vmem>>, %arg3: memref<2x128xf32, #tpu.memory_space<vmem>>) attributes {dimension_semantics = [#tpu.dimension_semantics<parallel>], iteration_bounds = array<i64: 1>, scalar_prefetch = 0 : i64, scratch_operands = 0 : i64, tpu.core_type = #tpu.core_type<tc>, window_params = [{transform_indices = @transform_0, window_bounds = array<i64: 8, 128>}, {pipeline_mode = #tpu.pipeline_mode<synchronous>, transform_indices = @transform_1, window_bounds = array<i64: 320, 128>}, {transform_indices = @transform_2, window_bounds = array<i64: 2, 128>}]} {
    %c0 = arith.constant 0 : index
    %c0_0 = arith.constant 0 : index
    %0 = vector.load %arg2[%c0, %c0_0] : memref<320x128xf32, #tpu.memory_space<vmem>>, vector<64x8xf32>
    %c0_1 = arith.constant 0 : index
    %c0_2 = arith.constant 0 : index
    %1 = vector.load %arg1[%c0_1, %c0_2] : memref<8x128xf32, #tpu.memory_space<vmem>>, vector<8x128xf32>
    %cst = arith.constant dense<0.000000e+00> : vector<64x128xf32>
    %2 = tpu.matmul %0, %1, %cst {dimension_numbers = #tpu.dot_dimension_numbers<[1], [0], [0], [1], [0, 0, 1, 1], [], []>, precision = #tpu.contract_precision<fp32>} : vector<64x8xf32>, vector<8x128xf32>, vector<64x128xf32> -> vector<64x128xf32>
    %cst_3 = arith.constant 0.000000e+00 : f32
    %3 = vector.broadcast %cst_3 : f32 to vector<64x128xf32>
    %4 = arith.subf %3, %2 : vector<64x128xf32>
    %5 = math.exp %4 : vector<64x128xf32>
    %cst_4 = arith.constant 1.000000e+00 : f32
    %6 = vector.broadcast %cst_4 : f32 to vector<64x128xf32>
    %7 = arith.addf %6, %5 : vector<64x128xf32>
    %8 = tpu.reciprocal %7 : vector<64x128xf32> -> vector<64x128xf32>
    %c64 = arith.constant 64 : index
    %c0_5 = arith.constant 0 : index
    %9 = vector.load %arg2[%c64, %c0_5] : memref<320x128xf32, #tpu.memory_space<vmem>>, vector<64x64xf32>
    %c64_6 = arith.constant 64 : index
    %c64_7 = arith.constant 64 : index
    %10 = vector.load %arg2[%c64_6, %c64_7] : memref<320x128xf32, #tpu.memory_space<vmem>>, vector<64x1xf32>
    %cst_8 = arith.constant dense<0.000000e+00> : vector<64x128xf32>
    %11 = tpu.matmul %9, %8, %cst_8 {dimension_numbers = #tpu.dot_dimension_numbers<[1], [0], [0], [1], [0, 0, 1, 1], [], []>, precision = #tpu.contract_precision<fp32>} : vector<64x64xf32>, vector<64x128xf32>, vector<64x128xf32> -> vector<64x128xf32>
    %12 = vector.broadcast %10 : vector<64x1xf32> to vector<64x128xf32>
    %13 = arith.addf %11, %12 : vector<64x128xf32>
    %cst_9 = arith.constant 0.000000e+00 : f32
    %14 = vector.broadcast %cst_9 : f32 to vector<64x128xf32>
    %15 = arith.subf %14, %13 : vector<64x128xf32>
    %16 = math.exp %15 : vector<64x128xf32>
    %cst_10 = arith.constant 1.000000e+00 : f32
    %17 = vector.broadcast %cst_10 : f32 to vector<64x128xf32>
    %18 = arith.addf %17, %16 : vector<64x128xf32>
    %19 = tpu.reciprocal %18 : vector<64x128xf32> -> vector<64x128xf32>
    %c128 = arith.constant 128 : index
    %c0_11 = arith.constant 0 : index
    %20 = vector.load %arg2[%c128, %c0_11] : memref<320x128xf32, #tpu.memory_space<vmem>>, vector<64x64xf32>
    %c128_12 = arith.constant 128 : index
    %c64_13 = arith.constant 64 : index
    %21 = vector.load %arg2[%c128_12, %c64_13] : memref<320x128xf32, #tpu.memory_space<vmem>>, vector<64x1xf32>
    %cst_14 = arith.constant dense<0.000000e+00> : vector<64x128xf32>
    %22 = tpu.matmul %20, %19, %cst_14 {dimension_numbers = #tpu.dot_dimension_numbers<[1], [0], [0], [1], [0, 0, 1, 1], [], []>, precision = #tpu.contract_precision<fp32>} : vector<64x64xf32>, vector<64x128xf32>, vector<64x128xf32> -> vector<64x128xf32>
    %23 = vector.broadcast %21 : vector<64x1xf32> to vector<64x128xf32>
    %24 = arith.addf %22, %23 : vector<64x128xf32>
    %cst_15 = arith.constant 0.000000e+00 : f32
    %25 = vector.broadcast %cst_15 : f32 to vector<64x128xf32>
    %26 = arith.subf %25, %24 : vector<64x128xf32>
    %27 = math.exp %26 : vector<64x128xf32>
    %cst_16 = arith.constant 1.000000e+00 : f32
    %28 = vector.broadcast %cst_16 : f32 to vector<64x128xf32>
    %29 = arith.addf %28, %27 : vector<64x128xf32>
    %30 = tpu.reciprocal %29 : vector<64x128xf32> -> vector<64x128xf32>
    %c192 = arith.constant 192 : index
    %c0_17 = arith.constant 0 : index
    %31 = vector.load %arg2[%c192, %c0_17] : memref<320x128xf32, #tpu.memory_space<vmem>>, vector<64x64xf32>
    %c192_18 = arith.constant 192 : index
    %c64_19 = arith.constant 64 : index
    %32 = vector.load %arg2[%c192_18, %c64_19] : memref<320x128xf32, #tpu.memory_space<vmem>>, vector<64x1xf32>
    %cst_20 = arith.constant dense<0.000000e+00> : vector<64x128xf32>
    %33 = tpu.matmul %31, %30, %cst_20 {dimension_numbers = #tpu.dot_dimension_numbers<[1], [0], [0], [1], [0, 0, 1, 1], [], []>, precision = #tpu.contract_precision<fp32>} : vector<64x64xf32>, vector<64x128xf32>, vector<64x128xf32> -> vector<64x128xf32>
    %34 = vector.broadcast %32 : vector<64x1xf32> to vector<64x128xf32>
    %35 = arith.addf %33, %34 : vector<64x128xf32>
    %cst_21 = arith.constant 0.000000e+00 : f32
    %36 = vector.broadcast %cst_21 : f32 to vector<64x128xf32>
    %37 = arith.subf %36, %35 : vector<64x128xf32>
    %38 = math.exp %37 : vector<64x128xf32>
    %cst_22 = arith.constant 1.000000e+00 : f32
    %39 = vector.broadcast %cst_22 : f32 to vector<64x128xf32>
    %40 = arith.addf %39, %38 : vector<64x128xf32>
    %41 = tpu.reciprocal %40 : vector<64x128xf32> -> vector<64x128xf32>
    %c256 = arith.constant 256 : index
    %c0_23 = arith.constant 0 : index
    %42 = vector.load %arg2[%c256, %c0_23] : memref<320x128xf32, #tpu.memory_space<vmem>>, vector<64x64xf32>
    %c256_24 = arith.constant 256 : index
    %c64_25 = arith.constant 64 : index
    %43 = vector.load %arg2[%c256_24, %c64_25] : memref<320x128xf32, #tpu.memory_space<vmem>>, vector<64x1xf32>
    %cst_26 = arith.constant dense<0.000000e+00> : vector<64x128xf32>
    %44 = tpu.matmul %42, %41, %cst_26 {dimension_numbers = #tpu.dot_dimension_numbers<[1], [0], [0], [1], [0, 0, 1, 1], [], []>, precision = #tpu.contract_precision<fp32>} : vector<64x64xf32>, vector<64x128xf32>, vector<64x128xf32> -> vector<64x128xf32>
    %45 = vector.broadcast %43 : vector<64x1xf32> to vector<64x128xf32>
    %46 = arith.addf %44, %45 : vector<64x128xf32>
    %47 = vector.extract_strided_slice %46 {offsets = [0, 0], sizes = [2, 128], strides = [1, 1]} : vector<64x128xf32> to vector<2x128xf32>
    %c0_27 = arith.constant 0 : index
    %c0_28 = arith.constant 0 : index
    %48 = vector.load %arg3[%c0_27, %c0_28] : memref<2x128xf32, #tpu.memory_space<vmem>>, vector<2x128xf32>
    tpu.vector_store %arg3[%c0_27, %c0_28], %47 {strides = array<i32>} : memref<2x128xf32, #tpu.memory_space<vmem>>, vector<2x128xf32>,
    return
  }
  func.func @transform_0(%arg0: i32) -> (i32, i32) {
    %c0_i32 = arith.constant 0 : i32
    %c0_i32_0 = arith.constant 0 : i32
    return %c0_i32, %arg0 : i32, i32
  }
  func.func @transform_1(%arg0: i32) -> (i32, i32) {
    %c0_i32 = arith.constant 0 : i32
    %c0_i32_0 = arith.constant 0 : i32
    %c0_i32_1 = arith.constant 0 : i32
    return %c0_i32, %c0_i32_0 : i32, i32
  }
  func.func @transform_2(%arg0: i32) -> (i32, i32) {
    %c0_i32 = arith.constant 0 : i32
    %c0_i32_0 = arith.constant 0 : i32
    return %c0_i32, %arg0 : i32, i32
  }
}

</mosaic_0001>

<bundles_post_ra>
// kernel: tpu_custom_call.1
= control target key start
LH: loop header
LB: loop body
LE: loop exit
PB: predicated region body
PF: predicated region fallthrough
CT: control target
= control target key end

     0   :  { %7 = vsyncpa [#allocation3], 0  ;;  %s4882_s0 = inlined_call_operand.hbm [shape: f32[8,128], index: 0, kind: input, shape index: {}]   ;;  %s4883_s1 = inlined_call_operand.hbm [shape: f32[320,128], index: 1, kind: input, shape index: {}]   ;;  %s4884_s2 = inlined_call_operand.hbm [shape: f32[2,128], index: 2, kind: output, shape index: {}]  }
   0x1   :  { %8 = vsyncpa [#allocation6], 0 }
   0x2   :  { %9 = vsyncpa [#allocation4], 0  ;;  %s15_s11 = sshll.u32 %s4882_s0, 4  ;;  %s3284_s12 = smov [#allocation2]   ;;  %s16_s11 = int_to_ptr.hbm [resolvable:$true] %s15_s11 }
   0x3   :  { %s17_s13 = sshll.u32 %s3284_s12, 4  ;;  %s25_s16 = sshll.u32 %s4883_s1, 4  ;;  %s18_s13 = int_to_ptr.vmem [resolvable:$true] %s17_s13  ;;  %s26_s16 = int_to_ptr.hbm [resolvable:$true] %s25_s16 }
   0x4   :  { %20 = dma.hbm_to_vmem [thread:$0]  %s16_s11, 128, %s18_s13, [#allocation3]  }
   0x5   :  { %s3285_s17 = smov [#allocation5]   ;;  %s3286_s19 = smov 128  }
   0x6   :  { %s27_s18 = sshll.u32 %s3285_s17, 4  ;;  %s3287_s20 = smov 8   ;;  %s28_s18 = int_to_ptr.vmem [resolvable:$true] %s27_s18 }
   0x7   :  { %33 = dma.hbm_to_vmem [thread:$0]  %s26_s16, 5120, %s28_s18, [#allocation6], %s3286_s19, %s3286_s19, %s3287_s20  }
   0x8   :  { %3278 = dma.done.wait [#allocation3], 128  }
   0x9   :  { %3279 = vsyncadd [#allocation3], 4294967168 }
   0xa   :  { %3280 = dma.done.wait [#allocation6], 5120  }
   0xb   :  { %3281 = vsyncadd [#allocation6], 4294962176  ;;  %vm51_vm0 = vcmask 64512   ;;  %v50_v0 = vld [vmem:[#allocation2] sm:$0xff]  ;;  %v46_v1 = vld [vmem:[#allocation5 + $0x20] sm:$0xff]  ;;  %s3289_s0 = smov [#allocation7]  }
   0xc   :  { %v47_v2 = vld [vmem:[#allocation5 + $0x28] sm:$0xff]  ;;  %v91_v3 = vand.u32 4294901760, %v50_v0  ;;  %v65_v4 = vsel %vm51_vm0, %v46_v1, 0  ;;  %v42_v6 = vld [vmem:[#allocation5] sm:$0xff]  ;;  %v48_v11 = vld [vmem:[#allocation5 + $0x30] sm:$0xff]  ;;  %s3045_s1 = sshll.u32 %s3289_s0, 4  ;;  %s3046_s1 = int_to_ptr.vmem [resolvable:$true] %s3045_s1 }
   0xd   :  { %v68_v5 = vsel %vm51_vm0, %v47_v2, 0  ;;  %v43_v7 = vld [vmem:[#allocation5 + $0x8] sm:$0xff]  ;;  %v3313_v8 = vand.u32 4294901760, %v65_v4  ;;  %v53_v10 = vsel %vm51_vm0, %v42_v6, 0  ;;  %v44_v15 = vld [vmem:[#allocation5 + $0x10] sm:$0xff]  ;;  %v71_v21 = vsel %vm51_vm0, %v48_v11, 0 }
   0xe   :  { %v3315_v9 = vand.u32 4294901760, %v68_v5  ;;  %3058 = vmatpush.msra.mxu2 %v91_v3  ;;  %v174_v12 = vsub.f32 %v50_v0, %v91_v3  ;;  %92 = vmatpush.msra.mxu0 %v91_v3  ;;  %v3318_v13 = vand.u32 4294901760, %v53_v10  ;;  %v56_v14 = vsel %vm51_vm0, %v43_v7, 0  ;;  %v49_v35 = vld [vmem:[#allocation5 + $0x38] sm:$0xff]  ;;  %s3047_s23 = sshll.u32 %s4884_s2, 4  ;;  %s3048_s23 = int_to_ptr.hbm [resolvable:$true] %s3047_s23 }
   0xf   :  { %v3322_v16 = vsub.f32 %v65_v4, %v3313_v8  ;;  %v3327_v18 = vand.u32 4294901760, %v56_v14  ;;  %v59_v24 = vsel %vm51_vm0, %v44_v15, 0  ;;  %v3343_v29 = vand.u32 4294901760, %v71_v21  ;;  %v45_v37 = vld [vmem:[#allocation5 + $0x18] sm:$0xff] }
  0x10   :  { %v3325_v17 = vsub.f32 %v68_v5, %v3315_v9  ;;  %v175_v19 = vand.u32 4294901760, %v174_v12  ;;  %v3330_v20 = vsub.f32 %v53_v10, %v3318_v13  ;;  %229 = vmatpush.msrb.mxu2 %v174_v12  ;;  %v109_v33 = vand.u32 4294901760, %v59_v24 }
  0x11   :  { %v127_v22 = vand.u32 4294901760, %v3322_v16  ;;  %v3335_v23 = vsub.f32 %v56_v14, %v3327_v18  ;;  %v3352_v39 = vsub.f32 %v71_v21, %v3343_v29  ;;  %v74_v41 = vsel %vm51_vm0, %v49_v35, 0 }
  0x12   :  { %v176_v25 = vsub.f32 %v174_v12, %v175_v19  ;;  %v95_v26 = vand.u32 4294901760, %v3330_v20  ;;  %355 = vmatpush.msrb.mxu0 %v175_v19  ;;  %v135_v28 = vand.u32 4294901760, %v3325_v17  ;;  %v110_v42 = vsub.f32 %v59_v24, %v109_v33 }
  0x13   :  { %v128_v27 = vsub.f32 %v3322_v16, %v127_v22  ;;  %v103_v32 = vand.u32 4294901760, %v3335_v23  ;;  %v62_v43 = vsel %vm51_vm0, %v45_v37, 0  ;;  %v143_v45 = vand.u32 4294901760, %v3352_v39 }
  0x14   :  { %v177_v30 = vand.u32 4294901760, %v176_v25  ;;  %v96_v31 = vsub.f32 %v3330_v20, %v95_v26  ;;  %v136_v38 = vsub.f32 %v3325_v17, %v135_v28  ;;  %v149_v46 = vand.u32 4294901760, %v74_v41 }
  0x15   :  { %v129_v34 = vand.u32 4294901760, %v128_v27  ;;  %v104_v40 = vsub.f32 %v3335_v23, %v103_v32  ;;  %v111_v48 = vand.u32 4294901760, %v110_v42  ;;  %v117_v49 = vand.u32 4294901760, %v62_v43 }
  0x16   :  { %3059 = vmatpush.msra.mxu3 %v177_v30  ;;  %178 = vmatpush.msra.mxu1 %v177_v30  ;;  %v97_v36 = vand.u32 4294901760, %v96_v31  ;;  %v137_v44 = vand.u32 4294901760, %v136_v38  ;;  %v144_v50 = vsub.f32 %v3352_v39, %v143_v45  ;;  %v150_v51 = vsub.f32 %v74_v41, %v149_v46 }
  0x17   :  { %130 = vmatmul.f32.vlgmr.msra.gmra.mxu2 %v129_v34  ;;  %196 = vmatmul.f32.vlgmr.msra.gmra.mxu3 %v3313_v8  ;;  %v105_v47 = vand.u32 4294901760, %v104_v40  ;;  %v112_v52 = vsub.f32 %v110_v42, %v111_v48  ;;  %v118_v53 = vsub.f32 %v62_v43, %v117_v49 }
  0x18   :  { %98 = vmatmul.f32.vlgmr.msra.gmra.mxu0 %v97_v36  ;;  %180 = vmatmul.f32.vlgmr.msra.gmra.mxu1 %v3318_v13  ;;  %v145_v54 = vand.u32 4294901760, %v144_v50  ;;  %v151_v55 = vand.u32 4294901760, %v150_v51 }
  0x19   :  { %287 = vmatpush.msrb.mxu3 %v91_v3  ;;  %405 = vmatpush.msrb.mxu1 %v91_v3  ;;  %v113_v56 = vand.u32 4294901760, %v112_v52  ;;  %v119_v57 = vand.u32 4294901760, %v118_v53 }
  0x1a   :  { %v152_v58 = vsub.f32 %v150_v51, %v151_v55 }
  0x1b   :  { %v120_v59 = vsub.f32 %v118_v53, %v119_v57 }
  0x1c   :  { %v153_v60 = vand.u32 4294901760, %v152_v58 }
  0x1d   :  { %v121_v61 = vand.u32 4294901760, %v120_v59 }
  0x1f   :  { %138 = vmatmul.f32.gmra.mxu2 %v137_v44  ;;  %200 = vmatmul.f32.gmra.mxu3 %v3315_v9 }
  0x20   :  { %106 = vmatmul.f32.gmra.mxu0 %v105_v47  ;;  %184 = vmatmul.f32.gmra.mxu1 %v3327_v18 }
  0x27   :  { %146 = vmatmul.f32.gmra.mxu2 %v145_v54  ;;  %204 = vmatmul.f32.gmra.mxu3 %v3343_v29 }
  0x28   :  { %114 = vmatmul.f32.gmra.mxu0 %v113_v56  ;;  %188 = vmatmul.f32.gmra.mxu1 %v109_v33 }
  0x2f   :  { %154 = vmatmul.f32.gmra.mxu2 %v153_v60  ;;  %208 = vmatmul.f32.gmra.mxu3 %v149_v46 }
  0x30   :  { %122 = vmatmul.f32.gmra.mxu0 %v121_v61  ;;  %192 = vmatmul.f32.gmra.mxu1 %v117_v49 }
  0x37   :  { %232 = vmatmul.f32.vlgmr.msrb.gmra.mxu2 %v3330_v20  ;;  %291 = vmatmul.f32.vlgmr.msrb.gmra.mxu3 %v95_v26 }
  0x38   :  { %357 = vmatmul.f32.vlgmr.msrb.gmra.mxu0 %v3318_v13  ;;  %407 = vmatmul.f32.vlgmr.msrb.gmra.mxu1 %v3318_v13 }
  0x3f   :  { %237 = vmatmul.f32.gmra.mxu2 %v3335_v23  ;;  %297 = vmatmul.f32.gmra.mxu3 %v103_v32 }
  0x40   :  { %361 = vmatmul.f32.gmra.mxu0 %v3327_v18  ;;  %411 = vmatmul.f32.gmra.mxu1 %v3327_v18 }
  0x47   :  { %242 = vmatmul.f32.gmra.mxu2 %v110_v42  ;;  %303 = vmatmul.f32.gmra.mxu3 %v111_v48 }
  0x48   :  { %365 = vmatmul.f32.gmra.mxu0 %v109_v33  ;;  %415 = vmatmul.f32.gmra.mxu1 %v109_v33 }
  0x4f   :  { %247 = vmatmul.f32.gmra.mxu2 %v118_v53  ;;  %309 = vmatmul.f32.gmra.mxu3 %v119_v57 }
  0x50   :  { %369 = vmatmul.f32.gmra.mxu0 %v117_v49  ;;  %419 = vmatmul.f32.gmra.mxu1 %v117_v49 }
  0x57   :  { %252 = vmatmul.f32.gmra.mxu2 %v3322_v16  ;;  %315 = vmatmul.f32.gmra.mxu3 %v127_v22 }
  0x58   :  { %373 = vmatmul.f32.gmra.mxu0 %v3313_v8  ;;  %423 = vmatmul.f32.gmra.mxu1 %v3313_v8 }
  0x5f   :  { %257 = vmatmul.f32.gmra.mxu2 %v3325_v17  ;;  %321 = vmatmul.f32.gmra.mxu3 %v135_v28 }
  0x60   :  { %377 = vmatmul.f32.gmra.mxu0 %v3315_v9  ;;  %427 = vmatmul.f32.gmra.mxu1 %v3315_v9 }
  0x67   :  { %262 = vmatmul.f32.gmra.mxu2 %v3352_v39  ;;  %327 = vmatmul.f32.gmra.mxu3 %v143_v45 }
  0x68   :  { %381 = vmatmul.f32.gmra.mxu0 %v3343_v29  ;;  %431 = vmatmul.f32.gmra.mxu1 %v3343_v29 }
  0x6f   :  { %267 = vmatmul.f32.gmra.mxu2 %v150_v51  ;;  %333 = vmatmul.f32.gmra.mxu3 %v151_v55 }
  0x70   :  { %385 = vmatmul.f32.gmra.mxu0 %v149_v46  ;;  %435 = vmatmul.f32.gmra.mxu1 %v149_v46 }
  0x95   :  { %v99_v62 = vpop.f32.mrf.mxu0  ;;  %v181_v63 = vpop.f32.mrf.mxu1 }
  0x96   :  { %v182_v24 = vadd.f32 %v181_v63, %v99_v62 }
  0x9a   :  { %v131_v0 = vpop.f32.mrf.mxu2  ;;  %v197_v1 = vpop.f32.mrf.mxu3 }
  0x9b   :  { %v198_v48 = vadd.f32 %v197_v1, %v131_v0 }
  0x9d   :  { %v107_v2 = vpop.f32.mrf.mxu0  ;;  %v185_v3 = vpop.f32.mrf.mxu1 }
  0x9e   :  { %v186_v27 = vadd.f32 %v185_v3, %v107_v2 }
  0xa2   :  { %v139_v4 = vpop.f32.mrf.mxu2  ;;  %v201_v5 = vpop.f32.mrf.mxu3 }
  0xa3   :  { %v202_v63 = vadd.f32 %v201_v5, %v139_v4 }
  0xa5   :  { %v115_v6 = vpop.f32.mrf.mxu0  ;;  %v189_v7 = vpop.f32.mrf.mxu1 }
  0xa6   :  { %v190_v29 = vadd.f32 %v189_v7, %v115_v6 }
  0xaa   :  { %v3382_v8 = vpop.f32.mrf.mxu2  ;;  %v3384_v9 = vpop.f32.mrf.mxu3 }
  0xab   :  { %v206_v4 = vadd.f32 %v3384_v9, %v3382_v8 }
  0xad   :  { %v123_v10 = vpop.f32.mrf.mxu0  ;;  %v193_v11 = vpop.f32.mrf.mxu1 }
  0xae   :  { %v194_v36 = vadd.f32 %v193_v11, %v123_v10 }
  0xb2   :  { %v3386_v12 = vpop.f32.mrf.mxu2  ;;  %v3388_v13 = vpop.f32.mrf.mxu3 }
  0xb3   :  { %v210_v9 = vadd.f32 %v3388_v13, %v3386_v12 }
  0xb5   :  { %v358_v14 = vpop.f32.mrf.mxu0  ;;  %v408_v15 = vpop.f32.mrf.mxu1 }
  0xba   :  { %v233_v16 = vpop.f32.mrf.mxu2  ;;  %v292_v17 = vpop.f32.mrf.mxu3 }
  0xbb   :  { %v234_v28 = vadd.f32 %v233_v16, %v182_v24 }
  0xbd   :  { %v362_v18 = vpop.f32.mrf.mxu0  ;;  %v412_v19 = vpop.f32.mrf.mxu1  ;;  %v293_v33 = vadd.f32 %v292_v17, %v234_v28 }
  0xbf   :  { %v359_v39 = vadd.f32 %v358_v14, %v293_v33 }
  0xc1   :  { %v409_v44 = vadd.f32 %v408_v15, %v359_v39 }
  0xc2   :  { %v238_v20 = vpop.f32.mrf.mxu2  ;;  %v298_v21 = vpop.f32.mrf.mxu3 }
  0xc3   :  { %v239_v30 = vadd.f32 %v238_v20, %v186_v27  ;;  %v439_v52 = vsub.f32 0.0, %v409_v44 }
  0xc5   :  { %v366_v22 = vpop.f32.mrf.mxu0  ;;  %v416_v23 = vpop.f32.mrf.mxu1  ;;  %v299_v35 = vadd.f32 %v298_v21, %v239_v30  ;;  %v447_v58 = vmul.f32 1.442695, %v439_v52 }
  0xc7   :  { %v363_v42 = vadd.f32 %v362_v18, %v299_v35  ;;  %3069 = vpow2.f32 %v447_v58 }
  0xc9   :  { %v413_v49 = vadd.f32 %v412_v19, %v363_v42 }
  0xca   :  { %v243_v25 = vpop.f32.mrf.mxu2  ;;  %v304_v26 = vpop.f32.mrf.mxu3 }
  0xcb   :  { %v244_v34 = vadd.f32 %v243_v25, %v190_v29  ;;  %v440_v56 = vsub.f32 0.0, %v413_v49 }
  0xcd   :  { %v370_v31 = vpop.f32.mrf.mxu0  ;;  %v420_v32 = vpop.f32.mrf.mxu1  ;;  %v305_v40 = vadd.f32 %v304_v26, %v244_v34  ;;  %v449_v2 = vmul.f32 1.442695, %v440_v56 }
  0xce   :  { %v3070_v19 = vpop.eup %3069 }
  0xcf   :  { %v367_v45 = vadd.f32 %v366_v22, %v305_v40  ;;  %3071 = vpow2.f32 %v449_v2  ;;  %v3392_v26 = vadd.f32 1.0, %v3070_v19 }
  0xd1   :  { %v417_v53 = vadd.f32 %v416_v23, %v367_v45 }
  0xd2   :  { %v248_v37 = vpop.f32.mrf.mxu2  ;;  %v310_v38 = vpop.f32.mrf.mxu3 }
  0xd3   :  { %v249_v41 = vadd.f32 %v248_v37, %v194_v36  ;;  %v441_v59 = vsub.f32 0.0, %v417_v53 }
  0xd5   :  { %v374_v43 = vpop.f32.mrf.mxu0  ;;  %v424_v46 = vpop.f32.mrf.mxu1  ;;  %v311_v47 = vadd.f32 %v310_v38, %v249_v41  ;;  %v451_v1 = vmul.f32 1.442695, %v441_v59 }
  0xd6   :  { %v3072_v23 = vpop.eup %3071 }
  0xd7   :  { %v371_v55 = vadd.f32 %v370_v31, %v311_v47  ;;  %3073 = vpow2.f32 %v451_v1 }
  0xd9   :  { %v421_v62 = vadd.f32 %v420_v32, %v371_v55  ;;  %v3394_v32 = vadd.f32 1.0, %v3072_v23 }
  0xda   :  { %v253_v50 = vpop.f32.mrf.mxu2  ;;  %v316_v51 = vpop.f32.mrf.mxu3 }
  0xdb   :  { %v254_v54 = vadd.f32 %v253_v50, %v198_v48  ;;  %v442_v14 = vsub.f32 0.0, %v421_v62  ;;  %vm490_vm8 = vweird.f32 %v3394_v32 }
  0xdd   :  { %v317_v57 = vadd.f32 %v316_v51, %v254_v54  ;;  %v378_v61 = vpop.f32.mrf.mxu0  ;;  %v428_v6 = vpop.f32.mrf.mxu1  ;;  %v453_v18 = vmul.f32 1.442695, %v442_v14  ;;  %v496_v14 = vand.u32 2147483648, %v3394_v32 }
  0xde   :  { %v3074_v28 = vpop.eup %3073 }
  0xdf   :  { %v375_v60 = vadd.f32 %v374_v43, %v317_v57  ;;  %v3397_v8 = vadd.f32 1.0, %v3074_v28 }
  0xe1   :  { %v425_v3 = vadd.f32 %v424_v46, %v375_v60  ;;  %vm504_vm1 = vweird.f32 %v3397_v8  ;;  %v508_v19 = vand.u32 2147483647, %v3397_v8  ;;  %v510_v23 = vand.u32 2147483648, %v3397_v8 }
  0xe2   :  { %v258_v7 = vpop.f32.mrf.mxu2  ;;  %v322_v0 = vpop.f32.mrf.mxu3 }
  0xe3   :  { %v443_v10 = vsub.f32 0.0, %v425_v3  ;;  %v259_v11 = vadd.f32 %v258_v7, %v202_v63 }
  0xe5   :  { %v455_v15 = vmul.f32 1.442695, %v443_v10  ;;  %v323_v16 = vadd.f32 %v322_v0, %v259_v11  ;;  %v382_v20 = vpop.f32.mrf.mxu0  ;;  %v432_v27 = vpop.f32.mrf.mxu1  ;;  %v494_v11 = vand.u32 2147483647, %v3394_v32 }
  0xe7   :  { %v379_v17 = vadd.f32 %v378_v61, %v323_v16  ;;  %3075 = vpow2.f32 %v455_v15  ;;  %v480_v15 = vand.u32 2147483647, %v3392_v26  ;;  %v482_v16 = vand.u32 2147483648, %v3392_v26 }
  0xe8   :  { %3077 = vpow2.f32 %v453_v18 }
  0xe9   :  { %v429_v5 = vadd.f32 %v428_v6, %v379_v17 }
  0xea   :  { %v263_v21 = vpop.f32.mrf.mxu2  ;;  %v328_v22 = vpop.f32.mrf.mxu3 }
  0xeb   :  { %v444_v24 = vsub.f32 0.0, %v429_v5  ;;  %v264_v25 = vadd.f32 %v263_v21, %v206_v4 }
  0xed   :  { %v457_v29 = vmul.f32 1.442695, %v444_v24  ;;  %v329_v30 = vadd.f32 %v328_v22, %v264_v25  ;;  %v3076_v31 = vpop.eup %3075  ;;  %v386_v41 = vpop.f32.mrf.mxu0 }
  0xee   :  { %v3401_v34 = vadd.f32 1.0, %v3076_v31  ;;  %v3078_v36 = vpop.eup %3077  ;;  %v436_v46 = vpop.f32.mrf.mxu1 }
  0xef   :  { %3079 = vpow2.f32 %v457_v29  ;;  %v383_v33 = vadd.f32 %v382_v20, %v329_v30  ;;  %v3405_v43 = vadd.f32 1.0, %v3078_v36 }
  0xf0   :  { %3081 = vrcp.f32 %v3392_v26  ;;  %vm532_vm5 = vweird.f32 %v3401_v34 }
  0xf1   :  { %v433_v35 = vadd.f32 %v432_v27, %v383_v33  ;;  %3083 = vrcp.f32 %v3394_v32  ;;  %vm518_vm3 = vweird.f32 %v3405_v43  ;;  %v522_v28 = vand.u32 2147483647, %v3405_v43 }
  0xf2   :  { %v268_v37 = vpop.f32.mrf.mxu2  ;;  %v334_v38 = vpop.f32.mrf.mxu3  ;;  %3085 = vrcp.f32 %v3397_v8  ;;  %v524_v29 = vand.u32 2147483648, %v3405_v43 }
  0xf3   :  { %v445_v39 = vsub.f32 0.0, %v433_v35  ;;  %v269_v40 = vadd.f32 %v268_v37, %v210_v9  ;;  %3087 = vrcp.f32 %v3401_v34 }
  0xf5   :  { %v3080_v42 = vpop.eup %3079  ;;  %v459_v44 = vmul.f32 1.442695, %v445_v39  ;;  %v335_v12 = vadd.f32 %v334_v38, %v269_v40 }
  0xf6   :  { %v3408_v13 = vpop.eup %3081  ;;  %v3410_v45 = vadd.f32 1.0, %v3080_v42  ;;  %v538_v42 = vand.u32 2147483648, %v3401_v34 }
  0xf7   :  { %3089 = vpow2.f32 %v459_v44  ;;  %v387_v47 = vadd.f32 %v386_v41, %v335_v12  ;;  %v3412_v48 = vpop.eup %3083  ;;  %v472_v49 = vmul.f32 %v3408_v13, %v3392_v26  ;;  %vm477_vm14 = vweird.f32 %v3408_v13  ;;  %v3634_v12 = vld [vmem:[#allocation5 + $0x58] sm:$0xff] }
  0xf8   :  { %3091 = vrcp.f32 %v3410_v45  ;;  %v3418_v51 = vpop.eup %3085  ;;  %v486_v53 = vmul.f32 %v3412_v48, %v3394_v32  ;;  %vm491_vm4 = vweird.f32 %v3412_v48  ;;  %vm546_vm11 = vweird.f32 %v3410_v45 }
  0xf9   :  { %3093 = vrcp.f32 %v3405_v43  ;;  %v437_v50 = vadd.f32 %v436_v46, %v387_v47  ;;  %v3420_v52 = vpop.eup %3087  ;;  %v473_v56 = vsub.f32 1.0, %v472_v49  ;;  %v500_v57 = vmul.f32 %v3418_v51, %v3397_v8 }
  0xfa   :  { %v528_v60 = vmul.f32 %v3420_v52, %v3401_v34  ;;  %v487_v63 = vsub.f32 1.0, %v486_v53  ;;  %vm505_vm2 = vweird.f32 %v3418_v51  ;;  %vm533_vm6 = vweird.f32 %v3420_v52 }
  0xfb   :  { %v446_v54 = vsub.f32 0.0, %v437_v50  ;;  %v501_v3 = vsub.f32 1.0, %v500_v57  ;;  %v474_v6 = vmul.f32 %v3408_v13, %v473_v56  ;;  %vm3482_vm10 = vmor %vm504_vm1, %vm505_vm2  ;;  %v552_v40 = vand.u32 2147483648, %v3410_v45 }
  0xfc   :  { %v529_v0 = vsub.f32 1.0, %v528_v60  ;;  %v488_v10 = vmul.f32 %v3412_v48, %v487_v63  ;;  %vm3490_vm12 = vmor %vm532_vm5, %vm533_vm6  ;;  %v550_v46 = vand.u32 2147483647, %v3410_v45  ;;  %v536_v47 = vand.u32 2147483647, %v3401_v34  ;;  %v3532_v63 = vld [vmem:[#allocation5 + $0x40] sm:$0xff] }
  0xfd   :  { %v3090_v55 = vpop.eup %3089  ;;  %v461_v58 = vmul.f32 1.442695, %v446_v54  ;;  %v502_v18 = vmul.f32 %v3418_v51, %v501_v3  ;;  %v3449_v4 = vadd.f32 %v3408_v13, %v474_v6  ;;  %vm3506_vm1 = vcmp.eq.f32.partialorder %v508_v19, 8.507059e+37 }
  0xfe   :  { %v3426_v59 = vpop.eup %3091  ;;  %v3430_v61 = vadd.f32 1.0, %v3090_v55  ;;  %v530_v22 = vmul.f32 %v3420_v52, %v529_v0  ;;  %v3459_v27 = vadd.f32 %v3412_v48, %v488_v10  ;;  %vm476_vm5 = vweird.f32 %v3392_v26  ;;  %v3538_v0 = vld [vmem:[#allocation5 + $0x68] sm:$0xff] }
  0xff   :  { %v3432_v62 = vpop.eup %3093  ;;  %v542_v2 = vmul.f32 %v3426_v59, %v3410_v45  ;;  %3095 = vpow2.f32 %v461_v58  ;;  %v3469_v31 = vadd.f32 %v3418_v51, %v502_v18  ;;  %vm547_vm7 = vweird.f32 %v3426_v59 }
 0x100   :  { %3097 = vrcp.f32 %v3430_v61  ;;  %v514_v7 = vmul.f32 %v3432_v62, %v3405_v43  ;;  %v566_v33 = vand.u32 2147483648, %v3430_v61  ;;  %v531_v9 = vadd.f32 %v3420_v52, %v530_v22  ;;  %vm3500_vm0 = vmor %vm546_vm11, %vm547_vm7 }
 0x101   :  { %v543_v1 = vsub.f32 1.0, %v542_v2  ;;  %v564_v37 = vand.u32 2147483647, %v3430_v61  ;;  %vm519_vm13 = vweird.f32 %v3432_v62  ;;  %vm560_vm15 = vweird.f32 %v3430_v61 }
 0x102   :  { %v515_v20 = vsub.f32 1.0, %v514_v7  ;;  %v567_v53 = vor.u32 1.1754944e-38, %v566_v33  ;;  %v535_v54 = vsel %vm3490_vm12, %v3420_v52, %v531_v9  ;;  %v507_v45 = vsel %vm3482_vm10, %v3418_v51, %v3469_v31  ;;  %vm3528_vm10 = vmor %vm518_vm3, %vm519_vm13 }
 0x103   :  { %v544_v25 = vmul.f32 %v3426_v59, %v543_v1  ;;  %vm565_vm6 = vcmp.eq.f32.partialorder %v564_v37, 8.507059e+37  ;;  %v553_v60 = vor.u32 1.1754944e-38, %v552_v40  ;;  %v539_v52 = vor.u32 1.1754944e-38, %v538_v42  ;;  %vm3547_vm12 = vmor %vm490_vm8, %vm491_vm4  ;;  %v3599_v37 = vld [vmem:[#allocation5 + $0x48] sm:$0xff] }
 0x104   :  { %v516_v35 = vmul.f32 %v3432_v62, %v515_v20  ;;  %vm551_vm7 = vcmp.eq.f32.partialorder %v550_v46, 8.507059e+37  ;;  %vm4885_vm11 = vcmask 523264   ;;  %v3288_v2 = vmov 64  }
 0x105   :  { %v3096_v17 = vpop.eup %3095  ;;  %v545_v38 = vadd.f32 %v3426_v59, %v544_v25  ;;  %3067 = vset.pattern.permute.xlu1 %v3288_v2  ;;  %3066 = vset.pattern.permute.xlu0 %v3288_v2  ;;  %v511_v19 = vor.u32 1.1754944e-38, %v510_v23  ;;  %v632_v20 = vsel %vm4885_vm11, %v3532_v63, 0  ;;  %vm523_vm8 = vcmp.eq.f32.partialorder %v522_v28, 8.507059e+37 }
 0x106   :  { %v3098_v5 = vpop.eup %3097  ;;  %v3451_v21 = vadd.f32 1.0, %v3096_v17  ;;  %v517_v55 = vadd.f32 %v3432_v62, %v516_v35  ;;  %3068 = vset.pattern.permute.xlu2 %v3288_v2  ;;  %618 = vperm.xlu1 %3067, %v3538_v0   ;;  %v483_v33 = vor.u32 1.1754944e-38, %v482_v16  ;;  %v3608_v16 = vld [vmem:[#allocation5 + $0x78] sm:$0xff]  ;;  %v634_v26 = vsel %vm4885_vm11, %v3599_v37, 0 }
 0x107   :  { %v556_v24 = vmul.f32 %v3098_v5, %v3430_v61  ;;  %vm561_vm9 = vweird.f32 %v3098_v5  ;;  %v549_v57 = vsel %vm3500_vm0, %v3426_v59, %v545_v38  ;;  %vm3576_vm0 = vmor %vm476_vm5, %vm477_vm14  ;;  %vm495_vm14 = vcmp.eq.f32.partialorder %v494_v11, 8.507059e+37  ;;  %628 = vperm.xlu0 %3066, %v3608_v16   ;;  %608 = vperm.xlu2 %3068, %v3634_v12  }
 0x108   :  { %3099 = vrcp.f32 %v3451_v21  ;;  %vm562_vm2 = vmor %vm560_vm15, %vm561_vm9  ;;  %vm537_vm9 = vcmp.eq.f32.partialorder %v536_v47, 8.507059e+37  ;;  %v580_v59 = vand.u32 2147483648, %v3451_v21  ;;  %v554_v3 = vsel %vm551_vm7, %v553_v60, %v549_v57 }
 0x109   :  { %v557_v30 = vsub.f32 1.0, %v556_v24  ;;  %v540_v6 = vsel %vm537_vm9, %v539_v52, %v535_v54  ;;  %v521_v7 = vsel %vm3528_vm10, %v3432_v62, %v517_v55  ;;  %v578_v10 = vand.u32 2147483647, %v3451_v21 }
 0x10a   :  { %v525_v62 = vor.u32 1.1754944e-38, %v524_v29  ;;  %vm574_vm4 = vweird.f32 %v3451_v21  ;;  %v3561_v24 = vand.u32 4294901760, %v554_v3  ;;  %v581_v25 = vor.u32 1.1754944e-38, %v580_v59 }
 0x10b   :  { %v558_v36 = vmul.f32 %v3098_v5, %v557_v30  ;;  %v3565_v8 = vand.u32 4294901760, %v540_v6  ;;  %v512_v29 = vsel %vm3506_vm1, %v511_v19, %v507_v45  ;;  %vm579_vm15 = vcmp.eq.f32.partialorder %v578_v10, 8.507059e+37 }
 0x10c   :  { %v526_v23 = vsel %vm523_vm8, %v525_v62, %v521_v7  ;;  %v497_v30 = vor.u32 1.1754944e-38, %v496_v14  ;;  %v479_v31 = vsel %vm3576_vm0, %v3408_v13, %v3449_v4  ;;  %v3593_v35 = vsub.f32 %v554_v3, %v3561_v24  ;;  %v3610_v4 = vld [vmem:[#allocation5 + $0x60] sm:$0xff] }
 0x10d   :  { %v559_v44 = vadd.f32 %v3098_v5, %v558_v36  ;;  %v3595_v36 = vand.u32 4294901760, %v526_v23  ;;  %v3602_v14 = vsub.f32 %v540_v6, %v3565_v8  ;;  %v3604_v38 = vand.u32 4294901760, %v512_v29 }
 0x10e   :  { %v3100_v50 = vpop.eup %3099  ;;  %vm481_vm1 = vcmp.eq.f32.partialorder %v480_v15, 8.507059e+37  ;;  %613 = vperm.xlu1 %3067, %v3610_v4   ;;  %v3653_v55 = vand.u32 4294901760, %v634_v26 }
 0x10f   :  { %v570_v34 = vmul.f32 %v3100_v50, %v3451_v21  ;;  %v563_v56 = vsel %vm562_vm2, %v3098_v5, %v559_v44  ;;  %vm575_vm3 = vweird.f32 %v3100_v50  ;;  %v493_v5 = vsel %vm3547_vm12, %v3412_v48, %v3459_v27 }
 0x110   :  { %v568_v58 = vsel %vm565_vm6, %v567_v53, %v563_v56  ;;  %vm576_vm13 = vmor %vm574_vm4, %vm575_vm3  ;;  %v3580_v21 = vand.u32 4294901760, %v632_v20  ;;  %v498_v13 = vsel %vm495_vm14, %v497_v30, %v493_v5  ;;  %v484_v39 = vsel %vm481_vm1, %v483_v33, %v479_v31 }
 0x111   :  { %v571_v61 = vsub.f32 1.0, %v570_v34  ;;  %v3541_v17 = vand.u32 4294901760, %v568_v58  ;;  %v3629_v41 = vsub.f32 %v526_v23, %v3595_v36  ;;  %v3631_v42 = vand.u32 4294901760, %v498_v13 }
 0x112   :  { %v3619_v40 = vsub.f32 %v632_v20, %v3580_v21  ;;  %v759_v44 = vand.u32 4294901760, %v3593_v35  ;;  %v3638_v46 = vsub.f32 %v512_v29, %v3604_v38  ;;  %v3640_v47 = vand.u32 4294901760, %v484_v39 }
 0x113   :  { %v572_v1 = vmul.f32 %v3100_v50, %v571_v61  ;;  %v3570_v27 = vsub.f32 %v568_v58, %v3541_v17  ;;  %v765_v49 = vand.u32 4294901760, %v3602_v14  ;;  %v3662_v56 = vsub.f32 %v498_v13, %v3631_v42  ;;  %v585_v58 = vld [vmem:[#allocation5 + $0x50] sm:$0xff] }
 0x114   :  { %v674_v54 = vand.u32 4294901760, %v3619_v40  ;;  %v760_v34 = vsub.f32 %v3593_v35, %v759_v44  ;;  %v771_v57 = vand.u32 4294901760, %v3629_v41  ;;  %v3667_v60 = vsub.f32 %v484_v39, %v3640_v47  ;;  %603 = vperm.xlu2 %3068, %v585_v58  }
 0x115   :  { %v573_v22 = vadd.f32 %v3100_v50, %v572_v1  ;;  %v753_v11 = vand.u32 4294901760, %v3570_v27  ;;  %v777_v52 = vand.u32 4294901760, %v3638_v46  ;;  %v766_v51 = vsub.f32 %v3602_v14, %v765_v49 }
 0x116   :  { %v675_v2 = vsub.f32 %v3619_v40, %v674_v54  ;;  %v3676_v59 = vsub.f32 %v634_v26, %v3653_v55  ;;  %v636_v3 = vsel %vm4885_vm11, %v585_v58, 0  ;;  %v761_v6 = vand.u32 4294901760, %v760_v34  ;;  %593 = vperm.xlu1 %3067, %v3532_v63   ;;  %v3768_v58 = vld [vmem:[#allocation5 + $0xa8] sm:$0xff] }
 0x117   :  { %v577_v48 = vsel %vm576_vm13, %v3100_v50, %v573_v22  ;;  %v754_v53 = vsub.f32 %v3570_v27, %v753_v11  ;;  %v772_v7 = vsub.f32 %v3629_v41, %v771_v57  ;;  %v783_v1 = vand.u32 4294901760, %v3662_v56 }
 0x118   :  { %v582_v28 = vsel %vm579_vm15, %v581_v25, %v577_v48  ;;  %v778_v10 = vsub.f32 %v3638_v46, %v777_v52  ;;  %v789_v18 = vand.u32 4294901760, %v3667_v60  ;;  %v767_v62 = vand.u32 4294901760, %v766_v51  ;;  %v1915_v51 = vld [vmem:[#allocation5 + $0xf8] sm:$0xff] }
 0x119   :  { %v3590_v9 = vand.u32 4294901760, %v582_v28  ;;  %v755_v61 = vand.u32 4294901760, %v754_v53  ;;  %v676_v19 = vand.u32 4294901760, %v675_v2  ;;  %v682_v5 = vand.u32 4294901760, %v3676_v59  ;;  %v1910_v2 = vld [vmem:[#allocation5 + $0xd0] sm:$0xff] }
 0x11a   :  { %v3694_v20 = vand.u32 4294901760, %v636_v3  ;;  %v773_v22 = vand.u32 4294901760, %v772_v7  ;;  %v784_v25 = vsub.f32 %v3662_v56, %v783_v1  ;;  %v779_v23 = vand.u32 4294901760, %v778_v10  ;;  %v3792_v7 = vld [vmem:[#allocation5 + $0x88] sm:$0xff]  ;;  %v1911_v10 = vld [vmem:[#allocation5 + $0xd8] sm:$0xff] }
 0x11b   :  { %657 = vmatpush.msra.mxu2 %v3590_v9  ;;  %908 = vmatpush.msra.mxu1 %v3590_v9  ;;  %v3615_v32 = vsub.f32 %v582_v28, %v3590_v9  ;;  %v790_v29 = vsub.f32 %v3667_v60, %v789_v18  ;;  %v683_v48 = vsub.f32 %v3676_v59, %v682_v5  ;;  %v589_v28 = vld [vmem:[#allocation5 + $0x70] sm:$0xff]  ;;  %v638_v30 = vsel %vm4885_vm11, %v3634_v12, 0 }
 0x11c   :  { %v689_v43 = vsub.f32 %v636_v3, %v3694_v20  ;;  %v785_v31 = vand.u32 4294901760, %v784_v25  ;;  %623 = vperm.xlu0 %3066, %v589_v28   ;;  %v646_v12 = vsel %vm4885_vm11, %v3608_v16, 0  ;;  %v2570_v3 = vld [vmem:[#allocation5 + $0x100] sm:$0xff] }
 0x11d   :  { %659 = vmatpush.msra.mxu2 %v3541_v17  ;;  %836 = vmatpush.msra.mxu0 %v3615_v32  ;;  %v747_v15 = vand.u32 4294901760, %v3615_v32  ;;  %v791_v33 = vand.u32 4294901760, %v790_v29  ;;  %v684_v13 = vand.u32 4294901760, %v683_v48 }
 0x11e   :  { %910 = vmatpush.msra.mxu1 %v3541_v17  ;;  %v690_v39 = vand.u32 4294901760, %v689_v43  ;;  %1281 = vperm.xlu1 %3067, %v3768_v58  }
 0x11f   :  { %661 = vmatpush.msra.mxu2 %v3561_v24  ;;  %839 = vmatpush.msra.mxu0 %v3570_v27  ;;  %v748_v50 = vsub.f32 %v3615_v32, %v747_v15  ;;  %v3713_v32 = vand.u32 4294901760, %v638_v30 }
 0x120   :  { %912 = vmatpush.msra.mxu1 %v3561_v24  ;;  %v691_v27 = vsub.f32 %v689_v43, %v690_v39 }
 0x121   :  { %663 = vmatpush.msra.mxu2 %v3565_v8  ;;  %842 = vmatpush.msra.mxu0 %v3593_v35  ;;  %v749_v45 = vand.u32 4294901760, %v748_v50  ;;  %v640_v35 = vsel %vm4885_vm11, %v3610_v4, 0 }
 0x122   :  { %914 = vmatpush.msra.mxu1 %v3565_v8  ;;  %v3732_v63 = vand.u32 4294901760, %v640_v35 }
 0x123   :  { %665 = vmatpush.msra.mxu2 %v3595_v36  ;;  %750 = vmatpush.msra.mxu3 %v749_v45 }
 0x124   :  { %845 = vmatpush.msra.mxu0 %v3602_v14  ;;  %916 = vmatpush.msra.mxu1 %v3595_v36 }
 0x125   :  { %667 = vmatpush.msra.mxu2 %v3604_v38  ;;  %756 = vmatpush.msra.mxu3 %v755_v61  ;;  %v1913_v61 = vld [vmem:[#allocation5 + $0xe8] sm:$0xff] }
 0x126   :  { %848 = vmatpush.msra.mxu0 %v3629_v41  ;;  %918 = vmatpush.msra.mxu1 %v3604_v38 }
 0x127   :  { %669 = vmatpush.msra.mxu2 %v3631_v42  ;;  %762 = vmatpush.msra.mxu3 %v761_v6  ;;  %v1909_v6 = vld [vmem:[#allocation5 + $0xc8] sm:$0xff] }
 0x128   :  { %851 = vmatpush.msra.mxu0 %v3638_v46  ;;  %920 = vmatpush.msra.mxu1 %v3631_v42  ;;  %v3755_v46 = vand.u32 4294901760, %v646_v12 }
 0x129   :  { %671 = vmatpush.msra.mxu2 %v3640_v47  ;;  %768 = vmatpush.msra.mxu3 %v767_v62 }
 0x12a   :  { %854 = vmatpush.msra.mxu0 %v3662_v56  ;;  %922 = vmatpush.msra.mxu1 %v3640_v47  ;;  %v729_v50 = vsub.f32 %v646_v12, %v3755_v46  ;;  %v3761_v56 = vld [vmem:[#allocation5 + $0xb0] sm:$0xff] }
 0x12b   :  { %677 = vmatmul.f32.vlgmr.msra.gmra.mxu2 %v676_v19  ;;  %774 = vmatpush.msra.mxu3 %v773_v22 }
 0x12c   :  { %983 = vmatpush.msrb.mxu2 %v747_v15  ;;  %857 = vmatpush.msra.mxu0 %v3667_v60  ;;  %v730_v45 = vand.u32 4294901760, %v729_v50  ;;  %v3774_v60 = vld [vmem:[#allocation5 + $0x80] sm:$0xff] }
 0x12d   :  { %780 = vmatpush.msra.mxu3 %v779_v23  ;;  %860 = vmatmul.f32.vlgmr.msra.gmra.mxu0 %v3619_v40 }
 0x12e   :  { %987 = vmatpush.msrb.mxu2 %v753_v11  ;;  %926 = vmatmul.f32.vlgmr.msra.gmra.mxu1 %v674_v54  ;;  %v697_v11 = vsub.f32 %v638_v30, %v3713_v32  ;;  %v731_v16 = vsub.f32 %v729_v50, %v730_v45 }
 0x12f   :  { %786 = vmatpush.msra.mxu3 %v785_v31  ;;  %598 = vperm.xlu0 %3066, %v3599_v37  }
 0x130   :  { %991 = vmatpush.msrb.mxu2 %v759_v44  ;;  %v698_v14 = vand.u32 4294901760, %v697_v11  ;;  %v732_v34 = vand.u32 4294901760, %v731_v16 }
 0x131   :  { %792 = vmatpush.msra.mxu3 %v791_v33 }
 0x132   :  { %995 = vmatpush.msrb.mxu2 %v765_v49  ;;  %794 = vmatmul.f32.vlgmr.msra.gmra.mxu3 %v3580_v21  ;;  %v699_v4 = vsub.f32 %v697_v11, %v698_v14 }
 0x133   :  { %685 = vmatmul.f32.gmra.mxu2 %v684_v13  ;;  %1054 = vmatpush.msrb.mxu3 %v3590_v9  ;;  %v692_v9 = vand.u32 4294901760, %v691_v27 }
 0x134   :  { %999 = vmatpush.msrb.mxu2 %v771_v57  ;;  %v3766_v57 = vld [vmem:[#allocation5 + $0x98] sm:$0xff] }
 0x135   :  { %1056 = vmatpush.msrb.mxu3 %v3541_v17  ;;  %865 = vmatmul.f32.gmra.mxu0 %v3676_v59  ;;  %v705_v17 = vsub.f32 %v640_v35, %v3732_v63  ;;  %v1912_v59 = vld [vmem:[#allocation5 + $0xe0] sm:$0xff] }
 0x136   :  { %1003 = vmatpush.msrb.mxu2 %v777_v52  ;;  %932 = vmatmul.f32.gmra.mxu1 %v682_v5  ;;  %v3776_v52 = vld [vmem:[#allocation5 + $0x90] sm:$0xff] }
 0x137   :  { %1058 = vmatpush.msrb.mxu3 %v3561_v24  ;;  %v642_v24 = vsel %vm4885_vm11, %v3538_v0, 0  ;;  %v706_v40 = vand.u32 4294901760, %v705_v17  ;;  %v644_v0 = vsel %vm4885_vm11, %v589_v28, 0  ;;  %1286 = vperm.xlu0 %3066, %v3761_v56  }
 0x138   :  { %1007 = vmatpush.msrb.mxu2 %v783_v1  ;;  %v3742_v37 = vand.u32 4294901760, %v642_v24  ;;  %1266 = vperm.xlu1 %3067, %v3776_v52   ;;  %v1914_v1 = vld [vmem:[#allocation5 + $0xf0] sm:$0xff] }
 0x139   :  { %1060 = vmatpush.msrb.mxu3 %v3565_v8  ;;  %v700_v8 = vand.u32 4294901760, %v699_v4  ;;  %v707_v26 = vsub.f32 %v705_v17, %v706_v40 }
 0x13a   :  { %1011 = vmatpush.msrb.mxu2 %v789_v18  ;;  %798 = vmatmul.f32.gmra.mxu3 %v3653_v55  ;;  %v1908_v18 = vld [vmem:[#allocation5 + $0xc0] sm:$0xff] }
 0x13b   :  { %693 = vmatmul.f32.gmra.mxu2 %v692_v9  ;;  %1062 = vmatpush.msrb.mxu3 %v3595_v36  ;;  %v713_v36 = vsub.f32 %v642_v24, %v3742_v37  ;;  %v708_v15 = vand.u32 4294901760, %v707_v26 }
 0x13d   :  { %1064 = vmatpush.msrb.mxu3 %v3604_v38  ;;  %870 = vmatmul.f32.gmra.mxu0 %v689_v43  ;;  %v3749_v38 = vand.u32 4294901760, %v644_v0  ;;  %v714_v41 = vand.u32 4294901760, %v713_v36 }
 0x13e   :  { %938 = vmatmul.f32.gmra.mxu1 %v690_v39 }
 0x13f   :  { %1066 = vmatpush.msrb.mxu3 %v3631_v42  ;;  %v721_v42 = vsub.f32 %v644_v0, %v3749_v38  ;;  %v715_v44 = vsub.f32 %v713_v36, %v714_v41  ;;  %1271 = vperm.xlu0 %3066, %v3766_v57  }
 0x140   :  { %1953 = vperm.xlu1 %3067, %v1915_v51  }
 0x141   :  { %1068 = vmatpush.msrb.mxu3 %v3640_v47  ;;  %v716_v47 = vand.u32 4294901760, %v715_v44  ;;  %v722_v49 = vand.u32 4294901760, %v721_v42 }
 0x142   :  { %802 = vmatmul.f32.gmra.mxu3 %v3694_v20 }
 0x143   :  { %701 = vmatmul.f32.gmra.mxu2 %v700_v8  ;;  %v723_v53 = vsub.f32 %v721_v42, %v722_v49 }
 0x145   :  { %875 = vmatmul.f32.gmra.mxu0 %v697_v11  ;;  %v724_v54 = vand.u32 4294901760, %v723_v53 }
 0x146   :  { %944 = vmatmul.f32.gmra.mxu1 %v698_v14 }
 0x147   :  { %1256 = vperm.xlu0 %3066, %v3774_v60  }
 0x148   :  { %1938 = vperm.xlu1 %3067, %v1912_v59  }
 0x14a   :  { %806 = vmatmul.f32.gmra.mxu3 %v3713_v32 }
 0x14b   :  { %709 = vmatmul.f32.gmra.mxu2 %v708_v15 }
 0x14d   :  { %880 = vmatmul.f32.gmra.mxu0 %v705_v17 }
 0x14e   :  { %950 = vmatmul.f32.gmra.mxu1 %v706_v40 }
 0x14f   :  { %1943 = vperm.xlu0 %3066, %v1913_v61  }
 0x150   :  { %1923 = vperm.xlu1 %3067, %v1909_v6  }
 0x152   :  { %810 = vmatmul.f32.gmra.mxu3 %v3732_v63 }
 0x153   :  { %717 = vmatmul.f32.gmra.mxu2 %v716_v47 }
 0x155   :  { %885 = vmatmul.f32.gmra.mxu0 %v713_v36 }
 0x156   :  { %956 = vmatmul.f32.gmra.mxu1 %v714_v41 }
 0x157   :  { %1928 = vperm.xlu0 %3066, %v1910_v2  }
 0x15a   :  { %814 = vmatmul.f32.gmra.mxu3 %v3742_v37 }
 0x15b   :  { %725 = vmatmul.f32.gmra.mxu2 %v724_v54 }
 0x15d   :  { %890 = vmatmul.f32.gmra.mxu0 %v721_v42 }
 0x15e   :  { %962 = vmatmul.f32.gmra.mxu1 %v722_v49 }
 0x15f   :  { %2580 = vperm.xlu0 %3066, %v2570_v3  }
 0x162   :  { %818 = vmatmul.f32.gmra.mxu3 %v3749_v38 }
 0x163   :  { %733 = vmatmul.f32.gmra.mxu2 %v732_v34 }
 0x165   :  { %895 = vmatmul.f32.gmra.mxu0 %v729_v50 }
 0x166   :  { %968 = vmatmul.f32.gmra.mxu1 %v730_v45 }
 0x16a   :  { %822 = vmatmul.f32.gmra.mxu3 %v3755_v46 }
 0x16b   :  { %1013 = vmatmul.f32.vlgmr.msrb.gmra.mxu2 %v3580_v21 }
 0x172   :  { %1070 = vmatmul.f32.vlgmr.msrb.gmra.mxu3 %v3580_v21  ;;  %v3784_v21 = vld [vmem:[#allocation5 + $0xb8] sm:$0xff] }
 0x173   :  { %1017 = vmatmul.f32.gmra.mxu2 %v3653_v55  ;;  %1291 = vperm.xlu2 %3068, %v3784_v21  }
 0x178   :  { %v619_v39 = vpop.permute.xlu1 %618 }
 0x179   :  { %v3808_v35 = vpop.permute.xlu0 %628 }
 0x17a   :  { %1074 = vmatmul.f32.gmra.mxu3 %v3653_v55  ;;  %v3788_v55 = vld [vmem:[#allocation5 + $0xa0] sm:$0xff] }
 0x17b   :  { %1021 = vmatmul.f32.gmra.mxu2 %v3694_v20  ;;  %1276 = vperm.xlu2 %3068, %v3788_v55  }
 0x180   :  { %v614_v9 = vpop.permute.xlu1 %613 }
 0x182   :  { %1078 = vmatmul.f32.gmra.mxu3 %v3694_v20 }
 0x183   :  { %1025 = vmatmul.f32.gmra.mxu2 %v3713_v32  ;;  %1261 = vperm.xlu2 %3068, %v3792_v7  }
 0x188   :  { %v594_v26 = vpop.permute.xlu1 %593 }
 0x18a   :  { %1082 = vmatmul.f32.gmra.mxu3 %v3713_v32 }
 0x18b   :  { %1029 = vmatmul.f32.gmra.mxu2 %v3732_v63  ;;  %1948 = vperm.xlu2 %3068, %v1914_v1  }
 0x18e   :  { %v624_v24 = vpop.permute.xlu0 %623 }
 0x192   :  { %1086 = vmatmul.f32.gmra.mxu3 %v3732_v63 }
 0x193   :  { %1033 = vmatmul.f32.gmra.mxu2 %v3742_v37  ;;  %1933 = vperm.xlu2 %3068, %v1911_v10  }
 0x19a   :  { %1090 = vmatmul.f32.gmra.mxu3 %v3742_v37  ;;  %v609_v37 = vpop.permute.xlu2 %608 }
 0x19b   :  { %1037 = vmatmul.f32.gmra.mxu2 %v3749_v38  ;;  %1918 = vperm.xlu2 %3068, %v1908_v18  }
 0x1a1   :  { %v599_v15 = vpop.permute.xlu0 %598 }
 0x1a2   :  { %1094 = vmatmul.f32.gmra.mxu3 %v3749_v38  ;;  %v604_v44 = vpop.permute.xlu2 %603 }
 0x1a3   :  { %1041 = vmatmul.f32.gmra.mxu2 %v3755_v46 }
 0x1aa   :  { %1098 = vmatmul.f32.gmra.mxu3 %v3755_v46  ;;  %v861_v30 = vpop.f32.mrf.mxu0 }
 0x1ab   :  { %v927_v13 = vpop.f32.mrf.mxu1 }
 0x1ae   :  { %v678_v62 = vpop.f32.mrf.mxu2 }
 0x1af   :  { %v679_v0 = vadd.f32 %v678_v62, %v594_v26 }
 0x1b2   :  { %v866_v11 = vpop.f32.mrf.mxu0 }
 0x1b3   :  { %v933_v63 = vpop.f32.mrf.mxu1 }
 0x1b5   :  { %v795_v19 = vpop.f32.mrf.mxu3 }
 0x1b6   :  { %v686_v5 = vpop.f32.mrf.mxu2  ;;  %v796_v42 = vadd.f32 %v795_v19, %v679_v0 }
 0x1b7   :  { %v687_v46 = vadd.f32 %v686_v5, %v599_v15 }
 0x1b8   :  { %v862_v50 = vadd.f32 %v861_v30, %v796_v42 }
 0x1ba   :  { %v871_v4 = vpop.f32.mrf.mxu0  ;;  %v928_v61 = vadd.f32 %v927_v13, %v862_v50 }
 0x1bb   :  { %v939_v8 = vpop.f32.mrf.mxu1 }
 0x1bd   :  { %v799_v20 = vpop.f32.mrf.mxu3 }
 0x1be   :  { %v694_v22 = vpop.f32.mrf.mxu2  ;;  %v800_v53 = vadd.f32 %v799_v20, %v687_v46 }
 0x1bf   :  { %v695_v49 = vadd.f32 %v694_v22, %v604_v44 }
 0x1c0   :  { %v867_v59 = vadd.f32 %v866_v11, %v800_v53 }
 0x1c2   :  { %v876_v38 = vpop.f32.mrf.mxu0  ;;  %v934_v19 = vadd.f32 %v933_v63, %v867_v59 }
 0x1c3   :  { %v945_v47 = vpop.f32.mrf.mxu1 }
 0x1c5   :  { %v803_v25 = vpop.f32.mrf.mxu3 }
 0x1c6   :  { %v702_v23 = vpop.f32.mrf.mxu2  ;;  %v804_v45 = vadd.f32 %v803_v25, %v695_v49 }
 0x1c7   :  { %v703_v54 = vadd.f32 %v702_v23, %v609_v37 }
 0x1c8   :  { %v872_v6 = vadd.f32 %v871_v4, %v804_v45 }
 0x1ca   :  { %v881_v16 = vpop.f32.mrf.mxu0  ;;  %v940_v5 = vadd.f32 %v939_v8, %v872_v6 }
 0x1cb   :  { %v951_v10 = vpop.f32.mrf.mxu1 }
 0x1cd   :  { %v807_v29 = vpop.f32.mrf.mxu3 }
 0x1ce   :  { %v710_v48 = vpop.f32.mrf.mxu2  ;;  %v808_v1 = vadd.f32 %v807_v29, %v703_v54 }
 0x1cf   :  { %v711_v51 = vadd.f32 %v710_v48, %v614_v9 }
 0x1d0   :  { %v877_v26 = vadd.f32 %v876_v38, %v808_v1 }
 0x1d2   :  { %v886_v0 = vpop.f32.mrf.mxu0  ;;  %v946_v9 = vadd.f32 %v945_v47, %v877_v26 }
 0x1d3   :  { %v957_v15 = vpop.f32.mrf.mxu1 }
 0x1d5   :  { %v811_v43 = vpop.f32.mrf.mxu3 }
 0x1d6   :  { %v718_v28 = vpop.f32.mrf.mxu2  ;;  %v812_v18 = vadd.f32 %v811_v43, %v711_v51 }
 0x1d7   :  { %v719_v20 = vadd.f32 %v718_v28, %v619_v39 }
 0x1d8   :  { %v882_v23 = vadd.f32 %v881_v16, %v812_v18 }
 0x1da   :  { %v891_v46 = vpop.f32.mrf.mxu0 }
 0x1db   :  { %v963_v16 = vpop.f32.mrf.mxu1 }
 0x1dd   :  { %v815_v31 = vpop.f32.mrf.mxu3 }
 0x1de   :  { %v3802_v33 = vpop.f32.mrf.mxu2  ;;  %v816_v4 = vadd.f32 %v815_v31, %v719_v20 }
 0x1df   :  { %v727_v28 = vadd.f32 %v3802_v33, %v624_v24 }
 0x1e0   :  { %v887_v39 = vadd.f32 %v886_v0, %v816_v4 }
 0x1e2   :  { %v958_v31 = vadd.f32 %v957_v15, %v887_v39 }
 0x1e5   :  { %v3804_v32 = vpop.f32.mrf.mxu3 }
 0x1e6   :  { %v3806_v27 = vpop.f32.mrf.mxu2  ;;  %v820_v50 = vadd.f32 %v3804_v32, %v727_v28 }
 0x1e7   :  { %v735_v24 = vadd.f32 %v3806_v27, %v3808_v35 }
 0x1ed   :  { %v3810_v14 = vpop.f32.mrf.mxu3 }
 0x1ee   :  { %v1014_v17 = vpop.f32.mrf.mxu2  ;;  %v824_v1 = vadd.f32 %v3810_v14, %v735_v24 }
 0x1ef   :  { %v1015_v3 = vadd.f32 %v1014_v17, %v928_v61  ;;  %v952_v17 = vadd.f32 %v951_v10, %v882_v23  ;;  %v892_v61 = vadd.f32 %v891_v46, %v820_v50  ;;  %v969_v23 = vpop.f32.mrf.mxu1 }
 0x1f1   :  { %v964_v32 = vadd.f32 %v963_v16, %v892_v61 }
 0x1f5   :  { %v1071_v40 = vpop.f32.mrf.mxu3 }
 0x1f6   :  { %v1018_v36 = vpop.f32.mrf.mxu2  ;;  %v1072_v62 = vadd.f32 %v1071_v40, %v1015_v3 }
 0x1f7   :  { %v1019_v22 = vadd.f32 %v1018_v36, %v934_v19 }
 0x1f8   :  { %v1102_v25 = vsub.f32 0.0, %v1072_v62  ;;  %v896_v62 = vpop.f32.mrf.mxu0 }
 0x1f9   :  { %v897_v26 = vadd.f32 %v896_v62, %v824_v1 }
 0x1fa   :  { %v1110_v29 = vmul.f32 1.442695, %v1102_v25 }
 0x1fc   :  { %3101 = vpow2.f32 %v1110_v29 }
 0x1fd   :  { %v1075_v41 = vpop.f32.mrf.mxu3 }
 0x1fe   :  { %v1022_v12 = vpop.f32.mrf.mxu2  ;;  %v1076_v48 = vadd.f32 %v1075_v41, %v1019_v22 }
 0x1ff   :  { %v1023_v13 = vadd.f32 %v1022_v12, %v940_v5 }
 0x200   :  { %v1103_v43 = vsub.f32 0.0, %v1076_v48  ;;  %v970_v48 = vadd.f32 %v969_v23, %v897_v26 }
 0x202   :  { %v1112_v12 = vmul.f32 1.442695, %v1103_v43  ;;  %v3102_v54 = vpop.eup %3101 }
 0x204   :  { %3103 = vpow2.f32 %v1112_v12 }
 0x205   :  { %v1079_v34 = vpop.f32.mrf.mxu3 }
 0x206   :  { %v1026_v2 = vpop.f32.mrf.mxu2  ;;  %v1080_v11 = vadd.f32 %v1079_v34, %v1023_v13 }
 0x207   :  { %v1027_v40 = vadd.f32 %v1026_v2, %v946_v9  ;;  %v3816_v2 = vadd.f32 1.0, %v3102_v54 }
 0x208   :  { %v1104_v8 = vsub.f32 0.0, %v1080_v11 }
 0x209   :  { %vm1139_vm5 = vweird.f32 %v3816_v2 }
 0x20a   :  { %v1114_v47 = vmul.f32 1.442695, %v1104_v8  ;;  %v3104_v6 = vpop.eup %3103 }
 0x20b   :  { %v3820_v5 = vadd.f32 1.0, %v3104_v6 }
 0x20c   :  { %3105 = vpow2.f32 %v1114_v47 }
 0x20d   :  { %v1083_v30 = vpop.f32.mrf.mxu3  ;;  %v1157_v1 = vand.u32 2147483647, %v3820_v5  ;;  %vm1153_vm0 = vweird.f32 %v3820_v5 }
 0x20e   :  { %v1030_v37 = vpop.f32.mrf.mxu2  ;;  %v1084_v38 = vadd.f32 %v1083_v30, %v1027_v40 }
 0x20f   :  { %v1031_v63 = vadd.f32 %v1030_v37, %v952_v17 }
 0x210   :  { %v1105_v49 = vsub.f32 0.0, %v1084_v38 }
 0x212   :  { %v1116_v34 = vmul.f32 1.442695, %v1105_v49  ;;  %v3106_v18 = vpop.eup %3105 }
 0x213   :  { %v3822_v22 = vadd.f32 1.0, %v3106_v18 }
 0x215   :  { %v1087_v36 = vpop.f32.mrf.mxu3  ;;  %v1173_v26 = vand.u32 2147483648, %v3822_v22  ;;  %vm1167_vm8 = vweird.f32 %v3822_v22 }
 0x216   :  { %v1034_v42 = vpop.f32.mrf.mxu2  ;;  %v1088_v44 = vadd.f32 %v1087_v36, %v1031_v63 }
 0x217   :  { %v1035_v45 = vadd.f32 %v1034_v42, %v958_v31  ;;  %v3859_v31 = vsel %vm4885_vm11, %v3774_v60, 0 }
 0x218   :  { %v1106_v41 = vsub.f32 0.0, %v1088_v44 }
 0x21a   :  { %v1118_v53 = vmul.f32 1.442695, %v1106_v41 }
 0x21c   :  { %3107 = vpow2.f32 %v1118_v53 }
 0x21d   :  { %v1091_v33 = vpop.f32.mrf.mxu3  ;;  %3109 = vpow2.f32 %v1116_v34  ;;  %v3872_v34 = vand.u32 4294901760, %v3859_v31 }
 0x21e   :  { %v1092_v51 = vadd.f32 %v1091_v33, %v1035_v45  ;;  %v1038_v59 = vpop.f32.mrf.mxu2  ;;  %3111 = vrcp.f32 %v3816_v2 }
 0x21f   :  { %v1039_v27 = vadd.f32 %v1038_v59, %v964_v32  ;;  %v1145_v59 = vand.u32 2147483648, %v3816_v2 }
 0x220   :  { %v1107_v3 = vsub.f32 0.0, %v1092_v51  ;;  %v1143_v51 = vand.u32 2147483647, %v3816_v2 }
 0x222   :  { %v1120_v10 = vmul.f32 1.442695, %v1107_v3  ;;  %v3108_v19 = vpop.eup %3107 }
 0x223   :  { %v3110_v20 = vpop.eup %3109  ;;  %v3824_v25 = vadd.f32 1.0, %v3108_v19 }
 0x224   :  { %3113 = vpow2.f32 %v1120_v10  ;;  %v3827_v37 = vpop.eup %3111  ;;  %v3830_v9 = vadd.f32 1.0, %v3110_v20  ;;  %v1159_v10 = vand.u32 2147483648, %v3820_v5 }
 0x225   :  { %v1095_v35 = vpop.f32.mrf.mxu3  ;;  %3115 = vrcp.f32 %v3820_v5  ;;  %v1135_v4 = vmul.f32 %v3827_v37, %v3816_v2  ;;  %vm1140_vm2 = vweird.f32 %v3827_v37 }
 0x226   :  { %v1096_v30 = vadd.f32 %v1095_v35, %v1039_v27  ;;  %v1042_v0 = vpop.f32.mrf.mxu2  ;;  %3117 = vrcp.f32 %v3822_v22  ;;  %vm3882_vm6 = vmor %vm1139_vm5, %vm1140_vm2  ;;  %v1171_v27 = vand.u32 2147483647, %v3822_v22  ;;  %vm1181_vm7 = vweird.f32 %v3830_v9 }
 0x227   :  { %3119 = vrcp.f32 %v3824_v25  ;;  %v1043_v29 = vadd.f32 %v1042_v0, %v970_v48  ;;  %v1136_v8 = vsub.f32 1.0, %v1135_v4  ;;  %vm1195_vm5 = vweird.f32 %v3824_v25 }
 0x228   :  { %v1108_v14 = vsub.f32 0.0, %v1096_v30 }
 0x229   :  { %v1137_v47 = vmul.f32 %v3827_v37, %v1136_v8 }
 0x22a   :  { %v3114_v13 = vpop.eup %3113  ;;  %v1122_v11 = vmul.f32 1.442695, %v1108_v14  ;;  %v1185_v14 = vand.u32 2147483647, %v3830_v9 }
 0x22b   :  { %v3833_v17 = vadd.f32 1.0, %v3114_v13  ;;  %v3838_v43 = vpop.eup %3115  ;;  %v3868_v16 = vadd.f32 %v3827_v37, %v1137_v47  ;;  %v1201_v47 = vand.u32 2147483648, %v3824_v25 }
 0x22c   :  { %3121 = vpow2.f32 %v1122_v11  ;;  %v3841_v63 = vpop.eup %3117  ;;  %v1149_v28 = vmul.f32 %v3838_v43, %v3820_v5  ;;  %vm1154_vm12 = vweird.f32 %v3838_v43 }
 0x22d   :  { %3123 = vrcp.f32 %v3833_v17  ;;  %v1099_v15 = vpop.f32.mrf.mxu3  ;;  %v3843_v36 = vpop.eup %3119  ;;  %v1163_v50 = vmul.f32 %v3841_v63, %v3822_v22  ;;  %v1142_v35 = vsel %vm3882_vm6, %v3827_v37, %v3868_v16  ;;  %vm1168_vm9 = vweird.f32 %v3841_v63 }
 0x22e   :  { %3125 = vrcp.f32 %v3830_v9  ;;  %v1100_v40 = vadd.f32 %v1099_v15, %v1043_v29  ;;  %v1150_v49 = vsub.f32 1.0, %v1149_v28  ;;  %v1191_v53 = vmul.f32 %v3843_v36, %v3824_v25 }
 0x22f   :  { %v1164_v24 = vsub.f32 1.0, %v1163_v50  ;;  %vm1209_vm13 = vweird.f32 %v3833_v17  ;;  %v1215_v15 = vand.u32 2147483648, %v3833_v17  ;;  %vm1196_vm15 = vweird.f32 %v3843_v36 }
 0x230   :  { %v1109_v38 = vsub.f32 0.0, %v1100_v40  ;;  %v1151_v60 = vmul.f32 %v3838_v43, %v1150_v49  ;;  %v1192_v61 = vsub.f32 1.0, %v1191_v53  ;;  %v1199_v40 = vand.u32 2147483647, %v3824_v25 }
 0x231   :  { %v1165_v0 = vmul.f32 %v3841_v63, %v1164_v24  ;;  %v1213_v28 = vand.u32 2147483647, %v3833_v17  ;;  %v1187_v25 = vand.u32 2147483648, %v3830_v9  ;;  %v1160_v22 = vor.u32 1.1754944e-38, %v1159_v10 }
 0x232   :  { %v3122_v39 = vpop.eup %3121  ;;  %v1124_v42 = vmul.f32 1.442695, %v1109_v38  ;;  %v3897_v30 = vadd.f32 %v3838_v43, %v1151_v60  ;;  %v1193_v23 = vmul.f32 %v3843_v36, %v1192_v61  ;;  %v1296_v10 = vsel %vm4885_vm11, %v3792_v7, 0 }
 0x233   :  { %v3847_v44 = vpop.eup %3123  ;;  %v3849_v12 = vadd.f32 1.0, %v3122_v39  ;;  %v1166_v60 = vadd.f32 %v3841_v63, %v1165_v0 }
 0x234   :  { %v3851_v41 = vpop.eup %3125  ;;  %v1205_v46 = vmul.f32 %v3847_v44, %v3833_v17  ;;  %3127 = vpow2.f32 %v1124_v42  ;;  %vm1210_vm10 = vweird.f32 %v3847_v44  ;;  %v1194_v39 = vadd.f32 %v3843_v36, %v1193_v23 }
 0x235   :  { %3129 = vrcp.f32 %v3849_v12  ;;  %v1177_v54 = vmul.f32 %v3851_v41, %v3830_v9  ;;  %v1229_v13 = vand.u32 2147483648, %v3849_v12  ;;  %vm1182_vm3 = vweird.f32 %v3851_v41  ;;  %vm3919_vm1 = vmor %vm1209_vm13, %vm1210_vm10 }
 0x236   :  { %v1206_v45 = vsub.f32 1.0, %v1205_v46  ;;  %v1227_v4 = vand.u32 2147483647, %v3849_v12  ;;  %vm1223_vm14 = vweird.f32 %v3849_v12  ;;  %vm1214_vm13 = vcmp.eq.f32.partialorder %v1213_v28, 8.507059e+37 }
 0x237   :  { %v1178_v6 = vsub.f32 1.0, %v1177_v54  ;;  %v1230_v46 = vor.u32 1.1754944e-38, %v1229_v13  ;;  %v1216_v54 = vor.u32 1.1754944e-38, %v1215_v15 }
 0x238   :  { %v1207_v19 = vmul.f32 %v3847_v44, %v1206_v45  ;;  %vm1228_vm10 = vcmp.eq.f32.partialorder %v1227_v4, 8.507059e+37 }
 0x239   :  { %v1179_v48 = vmul.f32 %v3851_v41, %v1178_v6 }
 0x23a   :  { %v3128_v33 = vpop.eup %3127  ;;  %v1208_v29 = vadd.f32 %v3847_v44, %v1207_v19 }
 0x23b   :  { %v3130_v3 = vpop.eup %3129  ;;  %v3878_v32 = vadd.f32 1.0, %v3128_v33 }
 0x23c   :  { %v1219_v62 = vmul.f32 %v3130_v3, %v3849_v12  ;;  %vm1224_vm4 = vweird.f32 %v3130_v3  ;;  %v1180_v12 = vadd.f32 %v3851_v41, %v1179_v48  ;;  %v1212_v17 = vsel %vm3919_vm1, %v3847_v44, %v1208_v29  ;;  %vm3948_vm1 = vmor %vm1181_vm7, %vm1182_vm3 }
 0x23d   :  { %3131 = vrcp.f32 %v3878_v32  ;;  %vm1225_vm2 = vmor %vm1223_vm14, %vm1224_vm4  ;;  %vm1200_vm14 = vcmp.eq.f32.partialorder %v1199_v40, 8.507059e+37  ;;  %v1217_v6 = vsel %vm1214_vm13, %v1216_v54, %v1212_v17  ;;  %v1241_v9 = vand.u32 2147483647, %v3878_v32 }
 0x23e   :  { %v1220_v20 = vsub.f32 1.0, %v1219_v62  ;;  %vm3935_vm4 = vmor %vm1195_vm5, %vm1196_vm15  ;;  %vm3952_vm15 = vcmp.eq.f32.partialorder %v1143_v51, 8.507059e+37  ;;  %v1202_v62 = vor.u32 1.1754944e-38, %v1201_v47  ;;  %vm1186_vm7 = vcmp.eq.f32.partialorder %v1185_v14, 8.507059e+37 }
 0x23f   :  { %v1198_v24 = vsel %vm3935_vm4, %v3843_v36, %v1194_v39  ;;  %v1184_v36 = vsel %vm3948_vm1, %v3851_v41, %v1180_v12  ;;  %v1188_v51 = vor.u32 1.1754944e-38, %v1187_v25  ;;  %vm3967_vm3 = vmor %vm1167_vm8, %vm1168_vm9  ;;  %vm3973_vm5 = vcmp.eq.f32.partialorder %v1171_v27, 8.507059e+37 }
 0x240   :  { %v1221_v11 = vmul.f32 %v3130_v3, %v1220_v20  ;;  %v1203_v23 = vsel %vm1200_vm14, %v1202_v62, %v1198_v24  ;;  %v3978_v48 = vand.u32 4294901760, %v1217_v6  ;;  %v1170_v14 = vsel %vm3967_vm3, %v3841_v63, %v1166_v60  ;;  %vm3987_vm9 = vmor %vm1153_vm0, %vm1154_vm12 }
 0x241   :  { %v1189_v4 = vsel %vm1186_vm7, %v1188_v51, %v1184_v36  ;;  %v1156_v29 = vsel %vm3987_vm9, %v3838_v43, %v3897_v30  ;;  %vm1242_vm4 = vcmp.eq.f32.partialorder %v1241_v9, 8.507059e+37  ;;  %v4000_v40 = vand.u32 4294901760, %v1203_v23 }
 0x242   :  { %v1222_v8 = vadd.f32 %v3130_v3, %v1221_v11  ;;  %v4011_v43 = vsub.f32 %v1217_v6, %v3978_v48  ;;  %v4013_v30 = vand.u32 4294901760, %v1189_v4  ;;  %vm1158_vm12 = vcmp.eq.f32.partialorder %v1157_v1, 8.507059e+37 }
 0x243   :  { %v3132_v42 = vpop.eup %3131  ;;  %v4019_v39 = vsub.f32 %v3859_v31, %v3872_v34  ;;  %v4036_v31 = vsub.f32 %v1203_v23, %v4000_v40  ;;  %v1298_v60 = vsel %vm4885_vm11, %v3776_v52, 0 }
 0x244   :  { %v1233_v49 = vmul.f32 %v3132_v42, %v3878_v32  ;;  %v1226_v50 = vsel %vm1225_vm2, %v3130_v3, %v1222_v8  ;;  %v1243_v3 = vand.u32 2147483648, %v3878_v32  ;;  %vm1238_vm2 = vweird.f32 %v3132_v42 }
 0x245   :  { %v1231_v53 = vsel %vm1228_vm10, %v1230_v46, %v1226_v50  ;;  %vm1237_vm10 = vweird.f32 %v3878_v32  ;;  %v1174_v32 = vor.u32 1.1754944e-38, %v1173_v26  ;;  %v1146_v26 = vor.u32 1.1754944e-38, %v1145_v59 }
 0x246   :  { %v1234_v33 = vsub.f32 1.0, %v1233_v49  ;;  %v3961_v20 = vand.u32 4294901760, %v1231_v53  ;;  %vm1239_vm8 = vmor %vm1237_vm10, %vm1238_vm2  ;;  %v1244_v27 = vor.u32 1.1754944e-38, %v1243_v3  ;;  %v4045_v16 = vsub.f32 %v1189_v4, %v4013_v30 }
 0x247   :  { %v1175_v38 = vsel %vm3973_vm5, %v1174_v32, %v1170_v14  ;;  %v1147_v2 = vsel %vm3952_vm15, %v1146_v26, %v1142_v35  ;;  %v1421_v18 = vand.u32 4294901760, %v4011_v43  ;;  %v1336_v35 = vand.u32 4294901760, %v4019_v39 }
 0x248   :  { %v1235_v19 = vmul.f32 %v3132_v42, %v1234_v33  ;;  %v3998_v15 = vsub.f32 %v1231_v53, %v3961_v20  ;;  %v4038_v7 = vand.u32 4294901760, %v1175_v38  ;;  %v4051_v46 = vand.u32 4294901760, %v1296_v10 }
 0x249   :  { %v4054_v47 = vand.u32 4294901760, %v1147_v2  ;;  %v1427_v17 = vand.u32 4294901760, %v4036_v31  ;;  %v1422_v54 = vsub.f32 %v4011_v43, %v1421_v18  ;;  %v1433_v25 = vand.u32 4294901760, %v4045_v16 }
 0x24a   :  { %v1236_v13 = vadd.f32 %v3132_v42, %v1235_v19  ;;  %v1415_v59 = vand.u32 4294901760, %v3998_v15  ;;  %v4065_v50 = vsub.f32 %v1175_v38, %v4038_v7  ;;  %v4081_v33 = vsub.f32 %v1296_v10, %v4051_v46 }
 0x24b   :  { %v4085_v24 = vsub.f32 %v1147_v2, %v4054_v47  ;;  %v1428_v61 = vsub.f32 %v4036_v31, %v1427_v17  ;;  %v1337_v52 = vsub.f32 %v4019_v39, %v1336_v35  ;;  %v1423_v6 = vand.u32 4294901760, %v1422_v54 }
 0x24c   :  { %v1240_v63 = vsel %vm1239_vm8, %v3132_v42, %v1236_v13  ;;  %v1161_v42 = vsel %vm1158_vm12, %v1160_v22, %v1156_v29  ;;  %v1416_v49 = vsub.f32 %v3998_v15, %v1415_v59  ;;  %v1439_v3 = vand.u32 4294901760, %v4065_v50 }
 0x24d   :  { %v1245_v8 = vsel %vm1242_vm4, %v1244_v27, %v1240_v63  ;;  %v4047_v1 = vand.u32 4294901760, %v1161_v42  ;;  %v1434_v62 = vsub.f32 %v4045_v16, %v1433_v25  ;;  %v4102_v19 = vand.u32 4294901760, %v1298_v60 }
 0x24e   :  { %v4008_v28 = vand.u32 4294901760, %v1245_v8  ;;  %v1417_v44 = vand.u32 4294901760, %v1416_v49  ;;  %v1451_v9 = vand.u32 4294901760, %v4085_v24  ;;  %v1429_v23 = vand.u32 4294901760, %v1428_v61 }
 0x24f   :  { %v4075_v45 = vsub.f32 %v1161_v42, %v4047_v1  ;;  %v1338_v51 = vand.u32 4294901760, %v1337_v52  ;;  %v1440_v0 = vsub.f32 %v4065_v50, %v1439_v3  ;;  %v1344_v41 = vand.u32 4294901760, %v4081_v33 }
 0x250   :  { %1319 = vmatpush.msrb.mxu0 %v4008_v28  ;;  %1570 = vmatpush.msra.mxu3 %v4008_v28  ;;  %v4033_v5 = vsub.f32 %v1245_v8, %v4008_v28  ;;  %v1435_v13 = vand.u32 4294901760, %v1434_v62  ;;  %v1351_v11 = vsub.f32 %v1298_v60, %v4102_v19  ;;  %v1452_v4 = vsub.f32 %v4085_v24, %v1451_v9 }
 0x251   :  { %v1445_v36 = vand.u32 4294901760, %v4075_v45  ;;  %v1441_v27 = vand.u32 4294901760, %v1440_v0  ;;  %v1345_v32 = vsub.f32 %v4081_v33, %v1344_v41  ;;  %v1300_v29 = vsel %vm4885_vm11, %v3766_v57, 0  ;;  %v4181_v0 = vpop.permute.xlu2 %1291 }
 0x252   :  { %1321 = vmatpush.msrb.mxu0 %v3961_v20  ;;  %1498 = vmatpush.msra.mxu2 %v4033_v5  ;;  %v1409_v37 = vand.u32 4294901760, %v4033_v5  ;;  %v4129_v8 = vand.u32 4294901760, %v1300_v29  ;;  %v1453_v38 = vand.u32 4294901760, %v1452_v4  ;;  %v1352_v22 = vand.u32 4294901760, %v1351_v11 }
 0x253   :  { %1572 = vmatpush.msra.mxu3 %v3961_v20  ;;  %v1446_v14 = vsub.f32 %v4075_v45, %v1445_v36  ;;  %v1346_v57 = vand.u32 4294901760, %v1345_v32 }
 0x254   :  { %1323 = vmatpush.msrb.mxu0 %v3978_v48  ;;  %1501 = vmatpush.msra.mxu2 %v3998_v15  ;;  %v1410_v12 = vsub.f32 %v4033_v5, %v1409_v37  ;;  %v1359_v15 = vsub.f32 %v1300_v29, %v4129_v8  ;;  %v1353_v26 = vsub.f32 %v1351_v11, %v1352_v22 }
 0x255   :  { %1574 = vmatpush.msra.mxu3 %v3978_v48  ;;  %v1447_v63 = vand.u32 4294901760, %v1446_v14 }
 0x256   :  { %1325 = vmatpush.msrb.mxu0 %v4000_v40  ;;  %1504 = vmatpush.msra.mxu2 %v4011_v43  ;;  %v1411_v53 = vand.u32 4294901760, %v1410_v12  ;;  %v1354_v10 = vand.u32 4294901760, %v1353_v26  ;;  %v1360_v42 = vand.u32 4294901760, %v1359_v15 }
 0x257   :  { %1576 = vmatpush.msra.mxu3 %v4000_v40 }
 0x258   :  { %1327 = vmatpush.msrb.mxu0 %v4013_v30  ;;  %1412 = vmatpush.msrb.mxu1 %v1411_v53 }
 0x259   :  { %1507 = vmatpush.msra.mxu2 %v4036_v31  ;;  %1578 = vmatpush.msra.mxu3 %v4013_v30  ;;  %v1306_v31 = vsel %vm4885_vm11, %v3761_v56, 0  ;;  %v1277_v32 = vpop.permute.xlu2 %1276 }
 0x25a   :  { %1329 = vmatpush.msrb.mxu0 %v4038_v7  ;;  %1418 = vmatpush.msrb.mxu1 %v1417_v44 }
 0x25b   :  { %1510 = vmatpush.msra.mxu2 %v4045_v16  ;;  %1580 = vmatpush.msra.mxu3 %v4038_v7 }
 0x25c   :  { %1331 = vmatpush.msrb.mxu0 %v4047_v1  ;;  %1424 = vmatpush.msrb.mxu1 %v1423_v6 }
 0x25d   :  { %1513 = vmatpush.msra.mxu2 %v4065_v50  ;;  %1582 = vmatpush.msra.mxu3 %v4047_v1 }
 0x25e   :  { %1333 = vmatpush.msrb.mxu0 %v4054_v47  ;;  %1430 = vmatpush.msrb.mxu1 %v1429_v23 }
 0x25f   :  { %1516 = vmatpush.msra.mxu2 %v4075_v45  ;;  %1584 = vmatpush.msra.mxu3 %v4054_v47 }
 0x260   :  { %1339 = vmatmul.f32.vlgmr.msrb.gmra.mxu0 %v1338_v51  ;;  %1436 = vmatpush.msrb.mxu1 %v1435_v13 }
 0x261   :  { %1645 = vmatpush.msra.mxu0 %v1409_v37  ;;  %1519 = vmatpush.msra.mxu2 %v4085_v24 }
 0x262   :  { %1442 = vmatpush.msrb.mxu1 %v1441_v27  ;;  %1522 = vmatmul.f32.vlgmr.msra.gmra.mxu2 %v4019_v39  ;;  %v1302_v39 = vsel %vm4885_vm11, %v3788_v55, 0 }
 0x263   :  { %1649 = vmatpush.msra.mxu0 %v1415_v59  ;;  %1588 = vmatmul.f32.vlgmr.msra.gmra.mxu3 %v1336_v35  ;;  %v4144_v43 = vand.u32 4294901760, %v1302_v39 }
 0x264   :  { %1448 = vmatpush.msrb.mxu1 %v1447_v63  ;;  %v1282_v63 = vpop.permute.xlu1 %1281 }
 0x265   :  { %1653 = vmatpush.msra.mxu0 %v1421_v18  ;;  %v1367_v55 = vsub.f32 %v1302_v39, %v4144_v43 }
 0x266   :  { %1454 = vmatpush.msrb.mxu1 %v1453_v38 }
 0x267   :  { %1657 = vmatpush.msra.mxu0 %v1427_v17  ;;  %1456 = vmatmul.f32.vlgmr.msrb.gmra.mxu1 %v3872_v34  ;;  %v1368_v2 = vand.u32 4294901760, %v1367_v55 }
 0x268   :  { %1347 = vmatmul.f32.gmra.mxu0 %v1346_v57  ;;  %1716 = vmatpush.msra.mxu1 %v4008_v28  ;;  %v1304_v28 = vsel %vm4885_vm11, %v3768_v58, 0  ;;  %v1382_v58 = vand.u32 4294901760, %v1306_v31 }
 0x269   :  { %1661 = vmatpush.msra.mxu0 %v1433_v25 }
 0x26a   :  { %1718 = vmatpush.msra.mxu1 %v3961_v20  ;;  %1527 = vmatmul.f32.gmra.mxu2 %v4081_v33  ;;  %v1361_v20 = vsub.f32 %v1359_v15, %v1360_v42  ;;  %v1383_v37 = vsub.f32 %v1306_v31, %v1382_v58 }
 0x26b   :  { %1665 = vmatpush.msra.mxu0 %v1439_v3  ;;  %1594 = vmatmul.f32.gmra.mxu3 %v1344_v41 }
 0x26c   :  { %1720 = vmatpush.msra.mxu1 %v3978_v48  ;;  %v1374_v48 = vand.u32 4294901760, %v1304_v28 }
 0x26d   :  { %1669 = vmatpush.msra.mxu0 %v1445_v36 }
 0x26e   :  { %1722 = vmatpush.msra.mxu1 %v4000_v40  ;;  %v1362_v40 = vand.u32 4294901760, %v1361_v20  ;;  %v1375_v5 = vsub.f32 %v1304_v28, %v1374_v48 }
 0x26f   :  { %1673 = vmatpush.msra.mxu0 %v1451_v9  ;;  %1460 = vmatmul.f32.gmra.mxu1 %v4051_v46  ;;  %v4179_v9 = vpop.permute.xlu0 %1286 }
 0x270   :  { %1355 = vmatmul.f32.gmra.mxu0 %v1354_v10  ;;  %1724 = vmatpush.msra.mxu1 %v4013_v30  ;;  %v1369_v30 = vsub.f32 %v1367_v55, %v1368_v2  ;;  %v1376_v59 = vand.u32 4294901760, %v1375_v5 }
 0x272   :  { %1726 = vmatpush.msra.mxu1 %v4038_v7  ;;  %1532 = vmatmul.f32.gmra.mxu2 %v1351_v11  ;;  %v1370_v7 = vand.u32 4294901760, %v1369_v30  ;;  %v1377_v16 = vsub.f32 %v1375_v5, %v1376_v59 }
 0x273   :  { %1600 = vmatmul.f32.gmra.mxu3 %v1352_v22 }
 0x274   :  { %1728 = vmatpush.msra.mxu1 %v4047_v1  ;;  %v1308_v1 = vsel %vm4885_vm11, %v3784_v21, 0  ;;  %v1378_v35 = vand.u32 4294901760, %v1377_v16 }
 0x275   :  { %v1390_v18 = vand.u32 4294901760, %v1308_v1 }
 0x276   :  { %1730 = vmatpush.msra.mxu1 %v4054_v47  ;;  %v1384_v47 = vand.u32 4294901760, %v1383_v37 }
 0x277   :  { %1464 = vmatmul.f32.gmra.mxu1 %v4102_v19  ;;  %v1391_v56 = vsub.f32 %v1308_v1, %v1390_v18  ;;  %v1272_v14 = vpop.permute.xlu0 %1271 }
 0x278   :  { %1363 = vmatmul.f32.gmra.mxu0 %v1362_v40  ;;  %v1385_v12 = vsub.f32 %v1383_v37, %v1384_v47 }
 0x279   :  { %v1392_v50 = vand.u32 4294901760, %v1391_v56 }
 0x27a   :  { %1537 = vmatmul.f32.gmra.mxu2 %v1359_v15  ;;  %v1386_v49 = vand.u32 4294901760, %v1385_v12 }
 0x27b   :  { %1606 = vmatmul.f32.gmra.mxu3 %v1360_v42  ;;  %v1393_v17 = vsub.f32 %v1391_v56, %v1392_v50  ;;  %v1267_v42 = vpop.permute.xlu1 %1266 }
 0x27d   :  { %v1394_v21 = vand.u32 4294901760, %v1393_v17 }
 0x27f   :  { %1468 = vmatmul.f32.gmra.mxu1 %v4129_v8 }
 0x280   :  { %1371 = vmatmul.f32.gmra.mxu0 %v1370_v7 }
 0x282   :  { %1542 = vmatmul.f32.gmra.mxu2 %v1367_v55 }
 0x283   :  { %1612 = vmatmul.f32.gmra.mxu3 %v1368_v2 }
 0x287   :  { %1472 = vmatmul.f32.gmra.mxu1 %v4144_v43 }
 0x288   :  { %1379 = vmatmul.f32.gmra.mxu0 %v1378_v35 }
 0x28a   :  { %1547 = vmatmul.f32.gmra.mxu2 %v1375_v5 }
 0x28b   :  { %1618 = vmatmul.f32.gmra.mxu3 %v1376_v59 }
 0x28f   :  { %1476 = vmatmul.f32.gmra.mxu1 %v1374_v48 }
 0x290   :  { %1387 = vmatmul.f32.gmra.mxu0 %v1386_v49 }
 0x292   :  { %1552 = vmatmul.f32.gmra.mxu2 %v1383_v37 }
 0x293   :  { %1624 = vmatmul.f32.gmra.mxu3 %v1384_v47 }
 0x297   :  { %1480 = vmatmul.f32.gmra.mxu1 %v1382_v58 }
 0x298   :  { %1395 = vmatmul.f32.gmra.mxu0 %v1394_v21 }
 0x29a   :  { %1557 = vmatmul.f32.gmra.mxu2 %v1391_v56 }
 0x29b   :  { %1630 = vmatmul.f32.gmra.mxu3 %v1392_v50 }
 0x29f   :  { %1484 = vmatmul.f32.gmra.mxu1 %v1390_v18 }
 0x2a0   :  { %1675 = vmatmul.f32.vlgmr.msra.gmra.mxu0 %v3872_v34 }
 0x2a7   :  { %1732 = vmatmul.f32.vlgmr.msra.gmra.mxu1 %v3872_v34 }
 0x2a8   :  { %1679 = vmatmul.f32.gmra.mxu0 %v4051_v46 }
 0x2af   :  { %1736 = vmatmul.f32.gmra.mxu1 %v4051_v46 }
 0x2b0   :  { %1683 = vmatmul.f32.gmra.mxu0 %v4102_v19 }
 0x2b7   :  { %1740 = vmatmul.f32.gmra.mxu1 %v4102_v19 }
 0x2b8   :  { %1687 = vmatmul.f32.gmra.mxu0 %v4129_v8 }
 0x2bf   :  { %1744 = vmatmul.f32.gmra.mxu1 %v4129_v8  ;;  %v1257_v8 = vpop.permute.xlu0 %1256 }
 0x2c0   :  { %1691 = vmatmul.f32.gmra.mxu0 %v4144_v43 }
 0x2c7   :  { %1748 = vmatmul.f32.gmra.mxu1 %v4144_v43  ;;  %v1262_v43 = vpop.permute.xlu2 %1261 }
 0x2c8   :  { %1695 = vmatmul.f32.gmra.mxu0 %v1374_v48 }
 0x2cf   :  { %1752 = vmatmul.f32.gmra.mxu1 %v1374_v48 }
 0x2d0   :  { %1699 = vmatmul.f32.gmra.mxu0 %v1382_v58 }
 0x2d7   :  { %1756 = vmatmul.f32.gmra.mxu1 %v1382_v58 }
 0x2d8   :  { %1703 = vmatmul.f32.gmra.mxu0 %v1390_v18 }
 0x2dd   :  { %v1340_v34 = vpop.f32.mrf.mxu0 }
 0x2de   :  { %v1341_v57 = vadd.f32 %v1340_v34, %v1257_v8 }
 0x2df   :  { %1760 = vmatmul.f32.gmra.mxu1 %v1390_v18 }
 0x2e4   :  { %v1457_v46 = vpop.f32.mrf.mxu1 }
 0x2e5   :  { %v1348_v53 = vpop.f32.mrf.mxu0  ;;  %v1523_v52 = vpop.f32.mrf.mxu2  ;;  %v1458_v15 = vadd.f32 %v1457_v46, %v1341_v57 }
 0x2e6   :  { %v1589_v62 = vpop.f32.mrf.mxu3  ;;  %v1349_v10 = vadd.f32 %v1348_v53, %v1262_v43 }
 0x2e7   :  { %v1524_v55 = vadd.f32 %v1523_v52, %v1458_v15 }
 0x2e9   :  { %v1590_v5 = vadd.f32 %v1589_v62, %v1524_v55 }
 0x2ec   :  { %v1461_v54 = vpop.f32.mrf.mxu1 }
 0x2ed   :  { %v1356_v45 = vpop.f32.mrf.mxu0  ;;  %v1528_v23 = vpop.f32.mrf.mxu2  ;;  %v1462_v28 = vadd.f32 %v1461_v54, %v1349_v10 }
 0x2ee   :  { %v1595_v51 = vpop.f32.mrf.mxu3  ;;  %v1357_v20 = vadd.f32 %v1356_v45, %v1267_v42 }
 0x2ef   :  { %v1529_v31 = vadd.f32 %v1528_v23, %v1462_v28 }
 0x2f1   :  { %v1596_v47 = vadd.f32 %v1595_v51, %v1529_v31 }
 0x2f4   :  { %v1465_v25 = vpop.f32.mrf.mxu1 }
 0x2f5   :  { %v1364_v60 = vpop.f32.mrf.mxu0  ;;  %v1533_v11 = vpop.f32.mrf.mxu2  ;;  %v1466_v48 = vadd.f32 %v1465_v25, %v1357_v20 }
 0x2f6   :  { %v1601_v27 = vpop.f32.mrf.mxu3  ;;  %v1365_v58 = vadd.f32 %v1364_v60, %v1272_v14 }
 0x2f7   :  { %v1534_v37 = vadd.f32 %v1533_v11, %v1466_v48 }
 0x2f9   :  { %v1602_v56 = vadd.f32 %v1601_v27, %v1534_v37 }
 0x2fc   :  { %v1469_v33 = vpop.f32.mrf.mxu1 }
 0x2fd   :  { %v1372_v24 = vpop.f32.mrf.mxu0  ;;  %v1538_v38 = vpop.f32.mrf.mxu2  ;;  %v1470_v16 = vadd.f32 %v1469_v33, %v1365_v58 }
 0x2fe   :  { %v1607_v39 = vpop.f32.mrf.mxu3  ;;  %v1373_v7 = vadd.f32 %v1372_v24, %v1277_v32 }
 0x2ff   :  { %v1539_v12 = vadd.f32 %v1538_v38, %v1470_v16 }
 0x301   :  { %v1608_v25 = vadd.f32 %v1607_v39, %v1539_v12 }
 0x304   :  { %v1473_v44 = vpop.f32.mrf.mxu1 }
 0x305   :  { %v1380_v61 = vpop.f32.mrf.mxu0  ;;  %v1543_v40 = vpop.f32.mrf.mxu2  ;;  %v1474_v18 = vadd.f32 %v1473_v44, %v1373_v7 }
 0x306   :  { %v1613_v1 = vpop.f32.mrf.mxu3  ;;  %v1381_v45 = vadd.f32 %v1380_v61, %v1282_v63 }
 0x307   :  { %v1544_v17 = vadd.f32 %v1543_v40, %v1474_v18 }
 0x309   :  { %v1614_v24 = vadd.f32 %v1613_v1, %v1544_v17 }
 0x30c   :  { %v1477_v3 = vpop.f32.mrf.mxu1 }
 0x30d   :  { %v4173_v6 = vpop.f32.mrf.mxu0  ;;  %v1548_v46 = vpop.f32.mrf.mxu2  ;;  %v1478_v52 = vadd.f32 %v1477_v3, %v1381_v45 }
 0x30e   :  { %v1619_v62 = vpop.f32.mrf.mxu3  ;;  %v1389_v61 = vadd.f32 %v4173_v6, %v4179_v9 }
 0x30f   :  { %v1549_v27 = vadd.f32 %v1548_v46, %v1478_v52 }
 0x311   :  { %v1620_v57 = vadd.f32 %v1619_v62, %v1549_v27 }
 0x314   :  { %v4175_v36 = vpop.f32.mrf.mxu1 }
 0x315   :  { %v4177_v19 = vpop.f32.mrf.mxu0  ;;  %v1553_v8 = vpop.f32.mrf.mxu2 }
 0x316   :  { %v1625_v43 = vpop.f32.mrf.mxu3  ;;  %v1397_v9 = vadd.f32 %v4177_v19, %v4181_v0 }
 0x31c   :  { %v4183_v41 = vpop.f32.mrf.mxu1 }
 0x31d   :  { %v1676_v13 = vpop.f32.mrf.mxu0  ;;  %v1558_v31 = vpop.f32.mrf.mxu2 }
 0x31e   :  { %v1677_v59 = vadd.f32 %v1676_v13, %v1590_v5  ;;  %v1631_v18 = vpop.f32.mrf.mxu3 }
 0x324   :  { %v1733_v4 = vpop.f32.mrf.mxu1 }
 0x325   :  { %v1680_v29 = vpop.f32.mrf.mxu0  ;;  %v1734_v35 = vadd.f32 %v1733_v4, %v1677_v59 }
 0x326   :  { %v1681_v49 = vadd.f32 %v1680_v29, %v1596_v47 }
 0x327   :  { %v1764_v21 = vsub.f32 0.0, %v1734_v35 }
 0x329   :  { %v1772_v33 = vmul.f32 1.442695, %v1764_v21 }
 0x32b   :  { %3133 = vpow2.f32 %v1772_v33 }
 0x32c   :  { %v1737_v22 = vpop.f32.mrf.mxu1 }
 0x32d   :  { %v1684_v26 = vpop.f32.mrf.mxu0  ;;  %v1738_v54 = vadd.f32 %v1737_v22, %v1681_v49  ;;  %v1482_v22 = vadd.f32 %v4175_v36, %v1389_v61 }
 0x32e   :  { %v1685_v53 = vadd.f32 %v1684_v26, %v1602_v56 }
 0x32f   :  { %v1765_v44 = vsub.f32 0.0, %v1738_v54  ;;  %v1554_v55 = vadd.f32 %v1553_v8, %v1482_v22 }
 0x331   :  { %v1774_v29 = vmul.f32 1.442695, %v1765_v44  ;;  %v3134_v26 = vpop.eup %3133  ;;  %v1626_v36 = vadd.f32 %v1625_v43, %v1554_v55 }
 0x332   :  { %v4188_v28 = vadd.f32 1.0, %v3134_v26 }
 0x333   :  { %3135 = vpow2.f32 %v1774_v29 }
 0x334   :  { %v1741_v2 = vpop.f32.mrf.mxu1  ;;  %vm1801_vm0 = vweird.f32 %v4188_v28  ;;  %v1807_v43 = vand.u32 2147483648, %v4188_v28 }
 0x335   :  { %v1688_v30 = vpop.f32.mrf.mxu0  ;;  %v1742_v60 = vadd.f32 %v1741_v2, %v1685_v53  ;;  %v1486_v2 = vadd.f32 %v4183_v41, %v1397_v9 }
 0x336   :  { %v1689_v23 = vadd.f32 %v1688_v30, %v1608_v25 }
 0x337   :  { %v1766_v13 = vsub.f32 0.0, %v1742_v60  ;;  %v1559_v16 = vadd.f32 %v1558_v31, %v1486_v2 }
 0x339   :  { %v1776_v38 = vmul.f32 1.442695, %v1766_v13  ;;  %v3136_v40 = vpop.eup %3135  ;;  %v1632_v49 = vadd.f32 %v1631_v18, %v1559_v16 }
 0x33a   :  { %v4194_v7 = vadd.f32 1.0, %v3136_v40 }
 0x33b   :  { %3137 = vpow2.f32 %v1776_v38 }
 0x33c   :  { %v1745_v50 = vpop.f32.mrf.mxu1  ;;  %vm1815_vm8 = vweird.f32 %v4194_v7 }
 0x33d   :  { %v1692_v34 = vpop.f32.mrf.mxu0  ;;  %v1746_v14 = vadd.f32 %v1745_v50, %v1689_v23 }
 0x33e   :  { %v1693_v51 = vadd.f32 %v1692_v34, %v1614_v24 }
 0x33f   :  { %v1767_v3 = vsub.f32 0.0, %v1746_v14 }
 0x341   :  { %v1778_v10 = vmul.f32 1.442695, %v1767_v3  ;;  %v3138_v30 = vpop.eup %3137 }
 0x342   :  { %v4196_v1 = vadd.f32 1.0, %v3138_v30 }
 0x344   :  { %v1749_v11 = vpop.f32.mrf.mxu1  ;;  %vm1829_vm5 = vweird.f32 %v4196_v1 }
 0x345   :  { %v1696_v4 = vpop.f32.mrf.mxu0  ;;  %v1750_v32 = vadd.f32 %v1749_v11, %v1693_v51 }
 0x346   :  { %v1697_v39 = vadd.f32 %v1696_v4, %v1620_v57  ;;  %v3197_v4 = vld [vmem:[#allocation5 + $0xc0] sm:$0xff] }
 0x347   :  { %v1768_v63 = vsub.f32 0.0, %v1750_v32  ;;  %v4232_v32 = vsel %vm4885_vm11, %v3197_v4, 0 }
 0x348   :  { %v4245_v3 = vand.u32 4294901760, %v4232_v32 }
 0x349   :  { %v1780_v15 = vmul.f32 1.442695, %v1768_v63 }
 0x34b   :  { %3139 = vpow2.f32 %v1780_v15 }
 0x34c   :  { %v1753_v42 = vpop.f32.mrf.mxu1  ;;  %3141 = vpow2.f32 %v1778_v10 }
 0x34d   :  { %v1754_v20 = vadd.f32 %v1753_v42, %v1697_v39  ;;  %v1700_v6 = vpop.f32.mrf.mxu0  ;;  %3143 = vrcp.f32 %v4188_v28  ;;  %v1805_v39 = vand.u32 2147483647, %v4188_v28 }
 0x34e   :  { %v1701_v59 = vadd.f32 %v1700_v6, %v1626_v36  ;;  %v1821_v6 = vand.u32 2147483648, %v4194_v7  ;;  %v1833_v36 = vand.u32 2147483647, %v4196_v1 }
 0x34f   :  { %v1769_v48 = vsub.f32 0.0, %v1754_v20  ;;  %v1819_v20 = vand.u32 2147483647, %v4194_v7 }
 0x351   :  { %v1782_v5 = vmul.f32 1.442695, %v1769_v48  ;;  %v3140_v58 = vpop.eup %3139 }
 0x352   :  { %v3142_v0 = vpop.eup %3141  ;;  %v4198_v35 = vadd.f32 1.0, %v3140_v58 }
 0x353   :  { %3145 = vpow2.f32 %v1782_v5  ;;  %v4201_v47 = vpop.eup %3143  ;;  %v4204_v50 = vadd.f32 1.0, %v3142_v0  ;;  %v1835_v5 = vand.u32 2147483648, %v4196_v1 }
 0x354   :  { %v1757_v37 = vpop.f32.mrf.mxu1  ;;  %3147 = vrcp.f32 %v4194_v7  ;;  %v1797_v34 = vmul.f32 %v4201_v47, %v4188_v28  ;;  %vm1802_vm6 = vweird.f32 %v4201_v47 }
 0x355   :  { %v1758_v19 = vadd.f32 %v1757_v37, %v1701_v59  ;;  %v1704_v56 = vpop.f32.mrf.mxu0  ;;  %3149 = vrcp.f32 %v4196_v1  ;;  %vm4255_vm13 = vmor %vm1801_vm0, %vm1802_vm6  ;;  %vm1843_vm14 = vweird.f32 %v4204_v50  ;;  %v1847_v59 = vand.u32 2147483647, %v4204_v50 }
 0x356   :  { %3151 = vrcp.f32 %v4198_v35  ;;  %v1705_v46 = vadd.f32 %v1704_v56, %v1632_v49  ;;  %v1798_v60 = vsub.f32 1.0, %v1797_v34  ;;  %vm1857_vm0 = vweird.f32 %v4198_v35 }
 0x357   :  { %v1770_v41 = vsub.f32 0.0, %v1758_v19 }
 0x358   :  { %v1799_v11 = vmul.f32 %v4201_v47, %v1798_v60  ;;  %v1863_v60 = vand.u32 2147483648, %v4198_v35 }
 0x359   :  { %v3146_v12 = vpop.eup %3145  ;;  %v1784_v17 = vmul.f32 1.442695, %v1770_v41 }
 0x35a   :  { %v4207_v21 = vadd.f32 1.0, %v3146_v12  ;;  %v4212_v54 = vpop.eup %3147  ;;  %v4241_v38 = vadd.f32 %v4201_v47, %v1799_v11  ;;  %v1861_v12 = vand.u32 2147483647, %v4198_v35 }
 0x35b   :  { %3153 = vpow2.f32 %v1784_v17  ;;  %v4215_v25 = vpop.eup %3149  ;;  %v1811_v33 = vmul.f32 %v4212_v54, %v4194_v7  ;;  %vm1816_vm7 = vweird.f32 %v4212_v54 }
 0x35c   :  { %3155 = vrcp.f32 %v4207_v21  ;;  %v1761_v53 = vpop.f32.mrf.mxu1  ;;  %v4217_v52 = vpop.eup %3151  ;;  %v1825_v29 = vmul.f32 %v4215_v25, %v4196_v1  ;;  %v1804_v2 = vsel %vm4255_vm13, %v4201_v47, %v4241_v38  ;;  %vm1830_vm1 = vweird.f32 %v4215_v25 }
 0x35d   :  { %3157 = vrcp.f32 %v4204_v50  ;;  %v1762_v45 = vadd.f32 %v1761_v53, %v1705_v46  ;;  %v1812_v27 = vsub.f32 1.0, %v1811_v33  ;;  %v1853_v61 = vmul.f32 %v4217_v52, %v4198_v35 }
 0x35e   :  { %v1826_v15 = vsub.f32 1.0, %v1825_v29  ;;  %vm1871_vm10 = vweird.f32 %v4207_v21  ;;  %v1877_v56 = vand.u32 2147483648, %v4207_v21  ;;  %vm1858_vm9 = vweird.f32 %v4217_v52 }
 0x35f   :  { %v1771_v24 = vsub.f32 0.0, %v1762_v45  ;;  %v1813_v57 = vmul.f32 %v4212_v54, %v1812_v27  ;;  %v1854_v26 = vsub.f32 1.0, %v1853_v61  ;;  %v1875_v34 = vand.u32 2147483647, %v4207_v21 }
 0x360   :  { %v1827_v37 = vmul.f32 %v4215_v25, %v1826_v15  ;;  %v1849_v35 = vand.u32 2147483648, %v4204_v50  ;;  %v1822_v1 = vor.u32 1.1754944e-38, %v1821_v6 }
 0x361   :  { %v3154_v62 = vpop.eup %3153  ;;  %v1786_v44 = vmul.f32 1.442695, %v1771_v24  ;;  %v4270_v30 = vadd.f32 %v4212_v54, %v1813_v57  ;;  %v1855_v58 = vmul.f32 %v4217_v52, %v1854_v26 }
 0x362   :  { %v4221_v23 = vpop.eup %3155  ;;  %v4223_v51 = vadd.f32 1.0, %v3154_v62  ;;  %v1828_v11 = vadd.f32 %v4215_v25, %v1827_v37  ;;  %v1850_v26 = vor.u32 1.1754944e-38, %v1849_v35 }
 0x363   :  { %v4225_v13 = vpop.eup %3157  ;;  %v1867_v14 = vmul.f32 %v4221_v23, %v4207_v21  ;;  %3159 = vpow2.f32 %v1786_v44  ;;  %vm1872_vm15 = vweird.f32 %v4221_v23  ;;  %v1856_v46 = vadd.f32 %v4217_v52, %v1855_v58 }
 0x364   :  { %3161 = vrcp.f32 %v4223_v51  ;;  %v1839_v63 = vmul.f32 %v4225_v13, %v4204_v50  ;;  %v1891_v16 = vand.u32 2147483648, %v4223_v51  ;;  %vm1844_vm2 = vweird.f32 %v4225_v13  ;;  %vm4292_vm12 = vmor %vm1871_vm10, %vm1872_vm15 }
 0x365   :  { %v1868_v8 = vsub.f32 1.0, %v1867_v14  ;;  %v1889_v18 = vand.u32 2147483647, %v4223_v51  ;;  %vm1885_vm4 = vweird.f32 %v4223_v51  ;;  %vm1876_vm10 = vcmp.eq.f32.partialorder %v1875_v34, 8.507059e+37 }
 0x366   :  { %v1840_v42 = vsub.f32 1.0, %v1839_v63  ;;  %v1892_v45 = vor.u32 1.1754944e-38, %v1891_v16 }
 0x367   :  { %v1869_v40 = vmul.f32 %v4221_v23, %v1868_v8  ;;  %vm1890_vm15 = vcmp.eq.f32.partialorder %v1889_v18, 8.507059e+37  ;;  %v1864_v8 = vor.u32 1.1754944e-38, %v1863_v60  ;;  %v3198_v18 = vld [vmem:[#allocation5 + $0xc8] sm:$0xff] }
 0x368   :  { %v1841_v19 = vmul.f32 %v4225_v13, %v1840_v42 }
 0x369   :  { %v3160_v22 = vpop.eup %3159  ;;  %v1870_v41 = vadd.f32 %v4221_v23, %v1869_v40 }
 0x36a   :  { %v3162_v10 = vpop.eup %3161  ;;  %v4251_v55 = vadd.f32 1.0, %v3160_v22  ;;  %v1842_v24 = vadd.f32 %v4225_v13, %v1841_v19 }
 0x36b   :  { %v1881_v48 = vmul.f32 %v3162_v10, %v4223_v51  ;;  %vm1886_vm3 = vweird.f32 %v3162_v10  ;;  %v1874_v21 = vsel %vm4292_vm12, %v4221_v23, %v1870_v41  ;;  %v1878_v51 = vor.u32 1.1754944e-38, %v1877_v56  ;;  %vm4321_vm12 = vmor %vm1843_vm14, %vm1844_vm2 }
 0x36c   :  { %3163 = vrcp.f32 %v4251_v55  ;;  %vm1887_vm6 = vmor %vm1885_vm4, %vm1886_vm3  ;;  %vm1862_vm4 = vcmp.eq.f32.partialorder %v1861_v12, 8.507059e+37  ;;  %v1905_v61 = vand.u32 2147483648, %v4251_v55  ;;  %v1903_v50 = vand.u32 2147483647, %v4251_v55 }
 0x36d   :  { %v1882_v31 = vsub.f32 1.0, %v1881_v48  ;;  %vm4308_vm3 = vmor %vm1857_vm0, %vm1858_vm9  ;;  %vm4325_vm9 = vcmp.eq.f32.partialorder %v1805_v39, 8.507059e+37  ;;  %v1879_v63 = vsel %vm1876_vm10, %v1878_v51, %v1874_v21  ;;  %vm1848_vm14 = vcmp.eq.f32.partialorder %v1847_v59, 8.507059e+37  ;;  %v3199_v21 = vld [vmem:[#allocation5 + $0xd0] sm:$0xff] }
 0x36e   :  { %v1860_v4 = vsel %vm4308_vm3, %v4217_v52, %v1856_v46  ;;  %v1846_v52 = vsel %vm4321_vm12, %v4225_v13, %v1842_v24  ;;  %vm4340_vm2 = vmor %vm1829_vm5, %vm1830_vm1  ;;  %vm4346_vm0 = vcmp.eq.f32.partialorder %v1833_v36, 8.507059e+37  ;;  %v4351_v42 = vand.u32 4294901760, %v1879_v63 }
 0x36f   :  { %v1883_v0 = vmul.f32 %v3162_v10, %v1882_v31  ;;  %v1865_v15 = vsel %vm1862_vm4, %v1864_v8, %v1860_v4  ;;  %v1832_v48 = vsel %vm4340_vm2, %v4215_v25, %v1828_v11  ;;  %vm4360_vm1 = vmor %vm1815_vm8, %vm1816_vm7  ;;  %v1906_v36 = vor.u32 1.1754944e-38, %v1905_v61 }
 0x370   :  { %v1851_v31 = vsel %vm1848_vm14, %v1850_v26, %v1846_v52  ;;  %v1818_v58 = vsel %vm4360_vm1, %v4212_v54, %v4270_v30  ;;  %vm1904_vm3 = vcmp.eq.f32.partialorder %v1903_v50, 8.507059e+37  ;;  %v4373_v37 = vand.u32 4294901760, %v1865_v15 }
 0x371   :  { %v1884_v49 = vadd.f32 %v3162_v10, %v1883_v0  ;;  %v4384_v54 = vsub.f32 %v1879_v63, %v4351_v42  ;;  %v4386_v30 = vand.u32 4294901760, %v1851_v31  ;;  %vm1820_vm7 = vcmp.eq.f32.partialorder %v1819_v20, 8.507059e+37 }
 0x372   :  { %v3164_v53 = vpop.eup %3163  ;;  %v1958_v41 = vsel %vm4885_vm11, %v3198_v18, 0  ;;  %v4393_v56 = vsub.f32 %v4232_v32, %v4245_v3  ;;  %v1823_v6 = vsel %vm1820_vm7, %v1822_v1, %v1818_v58 }
 0x373   :  { %v1895_v33 = vmul.f32 %v3164_v53, %v4251_v55  ;;  %v1888_v62 = vsel %vm1887_vm6, %v3162_v10, %v1884_v49  ;;  %vm1900_vm6 = vweird.f32 %v3164_v53  ;;  %v4417_v38 = vsub.f32 %v1851_v31, %v4386_v30 }
 0x374   :  { %v1893_v44 = vsel %vm1890_vm15, %v1892_v45, %v1888_v62  ;;  %vm1899_vm15 = vweird.f32 %v4251_v55  ;;  %v1836_v55 = vor.u32 1.1754944e-38, %v1835_v5  ;;  %v1808_v5 = vor.u32 1.1754944e-38, %v1807_v43 }
 0x375   :  { %v1896_v27 = vsub.f32 1.0, %v1895_v33  ;;  %v4334_v22 = vand.u32 4294901760, %v1893_v44  ;;  %vm1901_vm5 = vmor %vm1899_vm15, %vm1900_vm6  ;;  %v4408_v43 = vsub.f32 %v1865_v15, %v4373_v37  ;;  %v4419_v9 = vand.u32 4294901760, %v1823_v6 }
 0x376   :  { %v1837_v19 = vsel %vm4346_vm0, %v1836_v55, %v1832_v48  ;;  %v1809_v28 = vsel %vm4325_vm9, %v1808_v5, %v1804_v2  ;;  %v2083_v2 = vand.u32 4294901760, %v4384_v54  ;;  %v4422_v12 = vand.u32 4294901760, %v1958_v41  ;;  %v3201_v5 = vld [vmem:[#allocation5 + $0xe0] sm:$0xff] }
 0x377   :  { %v1897_v57 = vmul.f32 %v3164_v53, %v1896_v27  ;;  %v4371_v59 = vsub.f32 %v1893_v44, %v4334_v22  ;;  %v4410_v32 = vand.u32 4294901760, %v1837_v19  ;;  %v1998_v49 = vand.u32 4294901760, %v4393_v56 }
 0x378   :  { %v4426_v17 = vand.u32 4294901760, %v1809_v28  ;;  %v2089_v45 = vand.u32 4294901760, %v4408_v43  ;;  %v2084_v24 = vsub.f32 %v4384_v54, %v2083_v2  ;;  %v4447_v33 = vsub.f32 %v1823_v6, %v4419_v9  ;;  %v3202_v6 = vld [vmem:[#allocation5 + $0xe8] sm:$0xff] }
 0x379   :  { %v1898_v10 = vadd.f32 %v3164_v53, %v1897_v57  ;;  %v2077_v20 = vand.u32 4294901760, %v4371_v59  ;;  %v2095_v62 = vand.u32 4294901760, %v4417_v38  ;;  %v1960_v44 = vsel %vm4885_vm11, %v3199_v21, 0 }
 0x37a   :  { %v4452_v51 = vsub.f32 %v1958_v41, %v4422_v12  ;;  %v1999_v14 = vsub.f32 %v4393_v56, %v1998_v49  ;;  %v2090_v11 = vsub.f32 %v4408_v43, %v2089_v45  ;;  %v4463_v27 = vsub.f32 %v1809_v28, %v4426_v17 }
 0x37b   :  { %v1902_v25 = vsel %vm1901_vm5, %v3164_v53, %v1898_v10  ;;  %v2078_v46 = vsub.f32 %v4371_v59, %v2077_v20  ;;  %v4437_v53 = vsub.f32 %v1837_v19, %v4410_v32  ;;  %v2085_v23 = vand.u32 4294901760, %v2084_v24 }
 0x37c   :  { %v1907_v16 = vsel %vm1904_vm3, %v1906_v36, %v1902_v25  ;;  %v2096_v29 = vsub.f32 %v4417_v38, %v2095_v62  ;;  %v2107_v61 = vand.u32 4294901760, %v4447_v33  ;;  %v4473_v63 = vand.u32 4294901760, %v1960_v44  ;;  %v3200_v36 = vld [vmem:[#allocation5 + $0xd8] sm:$0xff] }
 0x37d   :  { %v4381_v0 = vand.u32 4294901760, %v1907_v16  ;;  %v2079_v35 = vand.u32 4294901760, %v2078_v46  ;;  %v2101_v4 = vand.u32 4294901760, %v4437_v53  ;;  %v2000_v8 = vand.u32 4294901760, %v1999_v14 }
 0x37e   :  { %v2091_v52 = vand.u32 4294901760, %v2090_v11  ;;  %v2113_v50 = vand.u32 4294901760, %v4463_v27  ;;  %v2006_v15 = vand.u32 4294901760, %v4452_v51  ;;  %v2097_v26 = vand.u32 4294901760, %v2096_v29 }
 0x37f   :  { %1981 = vmatpush.msrb.mxu2 %v4381_v0  ;;  %2232 = vmatpush.msrb.mxu1 %v4381_v0  ;;  %v4405_v7 = vsub.f32 %v1907_v16, %v4381_v0  ;;  %v2102_v57 = vsub.f32 %v4437_v53, %v2101_v4  ;;  %v2108_v39 = vsub.f32 %v4447_v33, %v2107_v61  ;;  %v1962_v31 = vsel %vm4885_vm11, %v3200_v36, 0 }
 0x380   :  { %v2013_v13 = vsub.f32 %v1960_v44, %v4473_v63  ;;  %v2114_v48 = vsub.f32 %v4463_v27, %v2113_v50  ;;  %v2007_v40 = vsub.f32 %v4452_v51, %v2006_v15  ;;  %v4499_v58 = vand.u32 4294901760, %v1962_v31 }
 0x381   :  { %1983 = vmatpush.msrb.mxu2 %v4334_v22  ;;  %2160 = vmatpush.msrb.mxu0 %v4405_v7  ;;  %v2071_v47 = vand.u32 4294901760, %v4405_v7  ;;  %v2103_v10 = vand.u32 4294901760, %v2102_v57  ;;  %v2109_v55 = vand.u32 4294901760, %v2108_v39  ;;  %v1964_v18 = vsel %vm4885_vm11, %v3201_v5, 0 }
 0x382   :  { %2234 = vmatpush.msrb.mxu1 %v4334_v22  ;;  %v2115_v25 = vand.u32 4294901760, %v2114_v48  ;;  %v2008_v16 = vand.u32 4294901760, %v2007_v40  ;;  %v2014_v19 = vand.u32 4294901760, %v2013_v13  ;;  %v1966_v28 = vsel %vm4885_vm11, %v3202_v6, 0 }
 0x383   :  { %1985 = vmatpush.msrb.mxu2 %v4351_v42  ;;  %2163 = vmatpush.msrb.mxu0 %v4371_v59  ;;  %v2072_v34 = vsub.f32 %v4405_v7, %v2071_v47  ;;  %v2021_v59 = vsub.f32 %v1962_v31, %v4499_v58 }
 0x384   :  { %2236 = vmatpush.msrb.mxu1 %v4351_v42  ;;  %v2015_v1 = vsub.f32 %v2013_v13, %v2014_v19 }
 0x385   :  { %1987 = vmatpush.msrb.mxu2 %v4373_v37  ;;  %2166 = vmatpush.msrb.mxu0 %v4384_v54  ;;  %v2073_v60 = vand.u32 4294901760, %v2072_v34  ;;  %v4513_v54 = vand.u32 4294901760, %v1964_v18  ;;  %v3204_v34 = vld [vmem:[#allocation5 + $0xf8] sm:$0xff] }
 0x386   :  { %2238 = vmatpush.msrb.mxu1 %v4373_v37  ;;  %v2016_v41 = vand.u32 4294901760, %v2015_v1 }
 0x387   :  { %1989 = vmatpush.msrb.mxu2 %v4386_v30  ;;  %2074 = vmatpush.msrb.mxu3 %v2073_v60 }
 0x388   :  { %2169 = vmatpush.msrb.mxu0 %v4408_v43  ;;  %2240 = vmatpush.msrb.mxu1 %v4386_v30 }
 0x389   :  { %1991 = vmatpush.msrb.mxu2 %v4410_v32  ;;  %2080 = vmatpush.msrb.mxu3 %v2079_v35 }
 0x38a   :  { %2172 = vmatpush.msrb.mxu0 %v4417_v38  ;;  %2242 = vmatpush.msrb.mxu1 %v4410_v32 }
 0x38b   :  { %1993 = vmatpush.msrb.mxu2 %v4419_v9  ;;  %2086 = vmatpush.msrb.mxu3 %v2085_v23 }
 0x38c   :  { %2175 = vmatpush.msrb.mxu0 %v4437_v53  ;;  %2244 = vmatpush.msrb.mxu1 %v4419_v9 }
 0x38d   :  { %1995 = vmatpush.msrb.mxu2 %v4426_v17  ;;  %2092 = vmatpush.msrb.mxu3 %v2091_v52  ;;  %v1944_v52 = vpop.permute.xlu0 %1943 }
 0x38e   :  { %2178 = vmatpush.msrb.mxu0 %v4447_v33  ;;  %2246 = vmatpush.msrb.mxu1 %v4426_v17 }
 0x38f   :  { %2001 = vmatmul.f32.vlgmr.msrb.gmra.mxu2 %v2000_v8  ;;  %2098 = vmatpush.msrb.mxu3 %v2097_v26 }
 0x390   :  { %2307 = vmatpush.msra.mxu2 %v2071_v47  ;;  %2181 = vmatpush.msrb.mxu0 %v4463_v27 }
 0x391   :  { %2104 = vmatpush.msrb.mxu3 %v2103_v10  ;;  %2184 = vmatmul.f32.vlgmr.msrb.gmra.mxu0 %v4393_v56  ;;  %v2022_v56 = vand.u32 4294901760, %v2021_v59 }
 0x392   :  { %2311 = vmatpush.msra.mxu2 %v2077_v20  ;;  %2250 = vmatmul.f32.vlgmr.msrb.gmra.mxu1 %v1998_v49  ;;  %v3203_v20 = vld [vmem:[#allocation5 + $0xf0] sm:$0xff] }
 0x393   :  { %2110 = vmatpush.msrb.mxu3 %v2109_v55  ;;  %v1968_v47 = vsel %vm4885_vm11, %v3203_v20, 0 }
 0x394   :  { %2315 = vmatpush.msra.mxu2 %v2083_v2 }
 0x395   :  { %2116 = vmatpush.msrb.mxu3 %v2115_v25  ;;  %v1929_v10 = vpop.permute.xlu0 %1928 }
 0x396   :  { %2319 = vmatpush.msra.mxu2 %v2089_v45  ;;  %2118 = vmatmul.f32.vlgmr.msrb.gmra.mxu3 %v4245_v3 }
 0x397   :  { %2009 = vmatmul.f32.gmra.mxu2 %v2008_v16  ;;  %2378 = vmatpush.msra.mxu3 %v4381_v0  ;;  %v2029_v0 = vsub.f32 %v1964_v18, %v4513_v54 }
 0x398   :  { %2323 = vmatpush.msra.mxu2 %v2095_v62 }
 0x399   :  { %2380 = vmatpush.msra.mxu3 %v4334_v22  ;;  %2189 = vmatmul.f32.gmra.mxu0 %v4452_v51  ;;  %v2023_v22 = vsub.f32 %v2021_v59, %v2022_v56  ;;  %v2030_v7 = vand.u32 4294901760, %v2029_v0  ;;  %v4539_v51 = vpop.permute.xlu1 %1953 }
 0x39a   :  { %2327 = vmatpush.msra.mxu2 %v2101_v4  ;;  %2256 = vmatmul.f32.gmra.mxu1 %v2006_v15 }
 0x39b   :  { %2382 = vmatpush.msra.mxu3 %v4351_v42  ;;  %v2036_v42 = vand.u32 4294901760, %v1966_v28 }
 0x39c   :  { %2331 = vmatpush.msra.mxu2 %v2107_v61 }
 0x39d   :  { %2384 = vmatpush.msra.mxu3 %v4373_v37  ;;  %v2024_v37 = vand.u32 4294901760, %v2023_v22  ;;  %v2037_v43 = vsub.f32 %v1966_v28, %v2036_v42 }
 0x39e   :  { %2335 = vmatpush.msra.mxu2 %v2113_v50  ;;  %2122 = vmatmul.f32.gmra.mxu3 %v4422_v12 }
 0x39f   :  { %2017 = vmatmul.f32.gmra.mxu2 %v2016_v41  ;;  %2386 = vmatpush.msra.mxu3 %v4386_v30  ;;  %v2031_v30 = vsub.f32 %v2029_v0, %v2030_v7  ;;  %v2038_v2 = vand.u32 4294901760, %v2037_v43 }
 0x3a1   :  { %2388 = vmatpush.msra.mxu3 %v4410_v32  ;;  %2194 = vmatmul.f32.gmra.mxu0 %v2013_v13  ;;  %v2044_v32 = vand.u32 4294901760, %v1968_v47  ;;  %v2032_v38 = vand.u32 4294901760, %v2031_v30  ;;  %v2039_v49 = vsub.f32 %v2037_v43, %v2038_v2  ;;  %v1939_v35 = vpop.permute.xlu1 %1938 }
 0x3a2   :  { %2262 = vmatmul.f32.gmra.mxu1 %v2014_v19 }
 0x3a3   :  { %2390 = vmatpush.msra.mxu3 %v4419_v9  ;;  %v2045_v9 = vsub.f32 %v1968_v47, %v2044_v32  ;;  %v2040_v53 = vand.u32 4294901760, %v2039_v49 }
 0x3a5   :  { %2392 = vmatpush.msra.mxu3 %v4426_v17  ;;  %v1970_v17 = vsel %vm4885_vm11, %v3204_v34, 0  ;;  %v2046_v45 = vand.u32 4294901760, %v2045_v9 }
 0x3a6   :  { %2126 = vmatmul.f32.gmra.mxu3 %v4473_v63  ;;  %v2052_v46 = vand.u32 4294901760, %v1970_v17 }
 0x3a7   :  { %2025 = vmatmul.f32.gmra.mxu2 %v2024_v37  ;;  %v2047_v24 = vsub.f32 %v2045_v9, %v2046_v45 }
 0x3a8   :  { %v2053_v60 = vsub.f32 %v1970_v17, %v2052_v46 }
 0x3a9   :  { %2199 = vmatmul.f32.gmra.mxu0 %v2021_v59  ;;  %v2048_v33 = vand.u32 4294901760, %v2047_v24  ;;  %v1924_v50 = vpop.permute.xlu1 %1923 }
 0x3aa   :  { %2268 = vmatmul.f32.gmra.mxu1 %v2022_v56  ;;  %v2054_v62 = vand.u32 4294901760, %v2053_v60 }
 0x3ac   :  { %v2055_v21 = vsub.f32 %v2053_v60, %v2054_v62 }
 0x3ae   :  { %2130 = vmatmul.f32.gmra.mxu3 %v4499_v58  ;;  %v2056_v44 = vand.u32 4294901760, %v2055_v21 }
 0x3af   :  { %2033 = vmatmul.f32.gmra.mxu2 %v2032_v38 }
 0x3b1   :  { %2204 = vmatmul.f32.gmra.mxu0 %v2029_v0 }
 0x3b2   :  { %2274 = vmatmul.f32.gmra.mxu1 %v2030_v7 }
 0x3b6   :  { %2134 = vmatmul.f32.gmra.mxu3 %v4513_v54 }
 0x3b7   :  { %2041 = vmatmul.f32.gmra.mxu2 %v2040_v53 }
 0x3b9   :  { %2209 = vmatmul.f32.gmra.mxu0 %v2037_v43 }
 0x3ba   :  { %2280 = vmatmul.f32.gmra.mxu1 %v2038_v2 }
 0x3be   :  { %2138 = vmatmul.f32.gmra.mxu3 %v2036_v42 }
 0x3bf   :  { %2049 = vmatmul.f32.gmra.mxu2 %v2048_v33 }
 0x3c1   :  { %2214 = vmatmul.f32.gmra.mxu0 %v2045_v9 }
 0x3c2   :  { %2286 = vmatmul.f32.gmra.mxu1 %v2046_v45 }
 0x3c6   :  { %2142 = vmatmul.f32.gmra.mxu3 %v2044_v32 }
 0x3c7   :  { %2057 = vmatmul.f32.gmra.mxu2 %v2056_v44 }
 0x3c9   :  { %2219 = vmatmul.f32.gmra.mxu0 %v2053_v60 }
 0x3ca   :  { %2292 = vmatmul.f32.gmra.mxu1 %v2054_v62 }
 0x3ce   :  { %2146 = vmatmul.f32.gmra.mxu3 %v2052_v46 }
 0x3cf   :  { %2337 = vmatmul.f32.vlgmr.msra.gmra.mxu2 %v4245_v3 }
 0x3d6   :  { %2394 = vmatmul.f32.vlgmr.msra.gmra.mxu3 %v4245_v3  ;;  %v1949_v3 = vpop.permute.xlu2 %1948 }
 0x3d7   :  { %2341 = vmatmul.f32.gmra.mxu2 %v4422_v12 }
 0x3de   :  { %2398 = vmatmul.f32.gmra.mxu3 %v4422_v12  ;;  %v1934_v12 = vpop.permute.xlu2 %1933 }
 0x3df   :  { %2345 = vmatmul.f32.gmra.mxu2 %v4473_v63 }
 0x3e6   :  { %2402 = vmatmul.f32.gmra.mxu3 %v4473_v63  ;;  %v1919_v11 = vpop.permute.xlu2 %1918 }
 0x3e7   :  { %2349 = vmatmul.f32.gmra.mxu2 %v4499_v58 }
 0x3ee   :  { %2406 = vmatmul.f32.gmra.mxu3 %v4499_v58 }
 0x3ef   :  { %2353 = vmatmul.f32.gmra.mxu2 %v4513_v54 }
 0x3f6   :  { %2410 = vmatmul.f32.gmra.mxu3 %v4513_v54 }
 0x3f7   :  { %2357 = vmatmul.f32.gmra.mxu2 %v2036_v42 }
 0x3fe   :  { %2414 = vmatmul.f32.gmra.mxu3 %v2036_v42 }
 0x3ff   :  { %2361 = vmatmul.f32.gmra.mxu2 %v2044_v32 }
 0x406   :  { %2418 = vmatmul.f32.gmra.mxu3 %v2044_v32 }
 0x407   :  { %2365 = vmatmul.f32.gmra.mxu2 %v2052_v46 }
 0x40e   :  { %2422 = vmatmul.f32.gmra.mxu3 %v2052_v46  ;;  %v2185_v23 = vpop.f32.mrf.mxu0 }
 0x40f   :  { %v2251_v63 = vpop.f32.mrf.mxu1 }
 0x412   :  { %v2002_v14 = vpop.f32.mrf.mxu2 }
 0x413   :  { %v2003_v27 = vadd.f32 %v2002_v14, %v1919_v11 }
 0x416   :  { %v2190_v42 = vpop.f32.mrf.mxu0 }
 0x417   :  { %v2257_v37 = vpop.f32.mrf.mxu1 }
 0x419   :  { %v2119_v4 = vpop.f32.mrf.mxu3 }
 0x41a   :  { %v2010_v29 = vpop.f32.mrf.mxu2  ;;  %v2120_v61 = vadd.f32 %v2119_v4, %v2003_v27 }
 0x41b   :  { %v2011_v15 = vadd.f32 %v2010_v29, %v1924_v50 }
 0x41c   :  { %v2186_v8 = vadd.f32 %v2185_v23, %v2120_v61 }
 0x41e   :  { %v2252_v57 = vadd.f32 %v2251_v63, %v2186_v8  ;;  %v2195_v20 = vpop.f32.mrf.mxu0 }
 0x41f   :  { %v2263_v47 = vpop.f32.mrf.mxu1 }
 0x421   :  { %v2123_v26 = vpop.f32.mrf.mxu3 }
 0x422   :  { %v2018_v39 = vpop.f32.mrf.mxu2  ;;  %v2124_v13 = vadd.f32 %v2123_v26, %v2011_v15 }
 0x423   :  { %v2019_v48 = vadd.f32 %v2018_v39, %v1929_v10 }
 0x424   :  { %v2191_v60 = vadd.f32 %v2190_v42, %v2124_v13 }
 0x426   :  { %v2200_v9 = vpop.f32.mrf.mxu0  ;;  %v2258_v62 = vadd.f32 %v2257_v37, %v2191_v60 }
 0x427   :  { %v2269_v17 = vpop.f32.mrf.mxu1 }
 0x429   :  { %v2127_v40 = vpop.f32.mrf.mxu3 }
 0x42a   :  { %v2026_v36 = vpop.f32.mrf.mxu2  ;;  %v2128_v31 = vadd.f32 %v2127_v40, %v2019_v48 }
 0x42b   :  { %v2027_v55 = vadd.f32 %v2026_v36, %v1934_v12 }
 0x42c   :  { %v2196_v24 = vadd.f32 %v2195_v20, %v2128_v31 }
 0x42e   :  { %v2205_v46 = vpop.f32.mrf.mxu0  ;;  %v2264_v21 = vadd.f32 %v2263_v47, %v2196_v24 }
 0x42f   :  { %v2275_v33 = vpop.f32.mrf.mxu1 }
 0x431   :  { %v2131_v58 = vpop.f32.mrf.mxu3 }
 0x432   :  { %v2034_v25 = vpop.f32.mrf.mxu2  ;;  %v2132_v16 = vadd.f32 %v2131_v58, %v2027_v55 }
 0x433   :  { %v2035_v19 = vadd.f32 %v2034_v25, %v1939_v35 }
 0x434   :  { %v2201_v44 = vadd.f32 %v2200_v9, %v2132_v16 }
 0x436   :  { %v2210_v27 = vpop.f32.mrf.mxu0  ;;  %v2270_v29 = vadd.f32 %v2269_v17, %v2201_v44 }
 0x437   :  { %v2281_v8 = vpop.f32.mrf.mxu1 }
 0x439   :  { %v2135_v59 = vpop.f32.mrf.mxu3 }
 0x43a   :  { %v2042_v1 = vpop.f32.mrf.mxu2  ;;  %v2136_v5 = vadd.f32 %v2135_v59, %v2035_v19 }
 0x43b   :  { %v2043_v18 = vadd.f32 %v2042_v1, %v1944_v52 }
 0x43c   :  { %v2206_v14 = vadd.f32 %v2205_v46, %v2136_v5 }
 0x43e   :  { %v2276_v63 = vadd.f32 %v2275_v33, %v2206_v14  ;;  %v2215_v58 = vpop.f32.mrf.mxu0 }
 0x43f   :  { %v2287_v1 = vpop.f32.mrf.mxu1 }
 0x441   :  { %v2139_v54 = vpop.f32.mrf.mxu3 }
 0x442   :  { %v2050_v41 = vpop.f32.mrf.mxu2  ;;  %v2140_v56 = vadd.f32 %v2139_v54, %v2043_v18 }
 0x443   :  { %v2051_v0 = vadd.f32 %v2050_v41, %v1949_v3 }
 0x444   :  { %v2211_v10 = vadd.f32 %v2210_v27, %v2140_v56 }
 0x446   :  { %v2282_v16 = vadd.f32 %v2281_v8, %v2211_v10 }
 0x447   :  { %v2293_v46 = vpop.f32.mrf.mxu1 }
 0x449   :  { %v2143_v22 = vpop.f32.mrf.mxu3 }
 0x44a   :  { %v4541_v6 = vpop.f32.mrf.mxu2  ;;  %v2144_v28 = vadd.f32 %v2143_v22, %v2051_v0 }
 0x44b   :  { %v2059_v22 = vadd.f32 %v4541_v6, %v4539_v51 }
 0x44c   :  { %v2216_v54 = vadd.f32 %v2215_v58, %v2144_v28 }
 0x451   :  { %v4543_v7 = vpop.f32.mrf.mxu3 }
 0x452   :  { %v2338_v43 = vpop.f32.mrf.mxu2  ;;  %v2148_v20 = vadd.f32 %v4543_v7, %v2059_v22 }
 0x453   :  { %v2339_v30 = vadd.f32 %v2338_v43, %v2252_v57 }
 0x459   :  { %v2395_v32 = vpop.f32.mrf.mxu3 }
 0x45a   :  { %v2342_v38 = vpop.f32.mrf.mxu2  ;;  %v2396_v2 = vadd.f32 %v2395_v32, %v2339_v30  ;;  %v2288_v30 = vadd.f32 %v2287_v1, %v2216_v54 }
 0x45b   :  { %v2343_v3 = vadd.f32 %v2342_v38, %v2258_v62  ;;  %v2220_v38 = vpop.f32.mrf.mxu0 }
 0x45c   :  { %v2426_v61 = vsub.f32 0.0, %v2396_v2  ;;  %v2221_v51 = vadd.f32 %v2220_v38, %v2148_v20 }
 0x45e   :  { %v2434_v26 = vmul.f32 1.442695, %v2426_v61  ;;  %v2294_v24 = vadd.f32 %v2293_v46, %v2221_v51 }
 0x460   :  { %3165 = vpow2.f32 %v2434_v26 }
 0x461   :  { %v2399_v49 = vpop.f32.mrf.mxu3 }
 0x462   :  { %v2346_v34 = vpop.f32.mrf.mxu2  ;;  %v2400_v4 = vadd.f32 %v2399_v49, %v2343_v3 }
 0x463   :  { %v2347_v35 = vadd.f32 %v2346_v34, %v2264_v21 }
 0x464   :  { %v2427_v52 = vsub.f32 0.0, %v2400_v4 }
 0x466   :  { %v2436_v36 = vmul.f32 1.442695, %v2427_v52  ;;  %v3166_v56 = vpop.eup %3165 }
 0x467   :  { %v4548_v47 = vadd.f32 1.0, %v3166_v56 }
 0x468   :  { %3167 = vpow2.f32 %v2436_v36 }
 0x469   :  { %v2403_v53 = vpop.f32.mrf.mxu3 }
 0x46a   :  { %v2350_v45 = vpop.f32.mrf.mxu2  ;;  %v2404_v23 = vadd.f32 %v2403_v53, %v2347_v35 }
 0x46b   :  { %v2351_v57 = vadd.f32 %v2350_v45, %v2270_v29 }
 0x46c   :  { %v2428_v50 = vsub.f32 0.0, %v2404_v23 }
 0x46e   :  { %v2438_v31 = vmul.f32 1.442695, %v2428_v50  ;;  %v3168_v37 = vpop.eup %3167 }
 0x46f   :  { %v4550_v28 = vadd.f32 1.0, %v3168_v37 }
 0x470   :  { %3169 = vpow2.f32 %v2438_v31 }
 0x471   :  { %v2407_v12 = vpop.f32.mrf.mxu3  ;;  %v2483_v54 = vand.u32 2147483648, %v4550_v28  ;;  %vm2477_vm0 = vweird.f32 %v4550_v28 }
 0x472   :  { %v2354_v11 = vpop.f32.mrf.mxu2  ;;  %v2408_v39 = vadd.f32 %v2407_v12, %v2351_v57 }
 0x473   :  { %v2355_v15 = vadd.f32 %v2354_v11, %v2276_v63 }
 0x474   :  { %v2429_v25 = vsub.f32 0.0, %v2408_v39 }
 0x476   :  { %v2440_v5 = vmul.f32 1.442695, %v2429_v25  ;;  %v3170_v43 = vpop.eup %3169 }
 0x477   :  { %v4552_v49 = vadd.f32 1.0, %v3170_v43 }
 0x479   :  { %v2411_v13 = vpop.f32.mrf.mxu3  ;;  %vm2491_vm13 = vweird.f32 %v4552_v49  ;;  %v2495_v43 = vand.u32 2147483647, %v4552_v49 }
 0x47a   :  { %v2358_v48 = vpop.f32.mrf.mxu2  ;;  %v2412_v40 = vadd.f32 %v2411_v13, %v2355_v15  ;;  %v3205_v13 = vld [vmem:[#allocation5 + $0x100] sm:$0xff] }
 0x47b   :  { %v2359_v59 = vadd.f32 %v2358_v48, %v2282_v16  ;;  %v4590_v10 = vsel %vm4885_vm11, %v3205_v13, 0  ;;  %v2467_v16 = vand.u32 2147483647, %v4548_v47  ;;  %vm2463_vm11 = vweird.f32 %v4548_v47 }
 0x47c   :  { %v2430_v55 = vsub.f32 0.0, %v2412_v40  ;;  %v4598_v58 = vand.u32 4294901760, %v4590_v10 }
 0x47e   :  { %v2442_v19 = vmul.f32 1.442695, %v2430_v55 }
 0x480   :  { %3171 = vpow2.f32 %v2442_v19  ;;  %v2469_v19 = vand.u32 2147483648, %v4548_v47 }
 0x481   :  { %v2415_v18 = vpop.f32.mrf.mxu3  ;;  %3173 = vpow2.f32 %v2440_v5 }
 0x482   :  { %v2416_v41 = vadd.f32 %v2415_v18, %v2359_v59  ;;  %v2362_v0 = vpop.f32.mrf.mxu2  ;;  %v2481_v18 = vand.u32 2147483647, %v4550_v28 }
 0x483   :  { %v2363_v9 = vadd.f32 %v2362_v0, %v2288_v30  ;;  %v2497_v30 = vand.u32 2147483648, %v4552_v49 }
 0x484   :  { %v2431_v42 = vsub.f32 0.0, %v2416_v41 }
 0x486   :  { %v2444_v32 = vmul.f32 1.442695, %v2431_v42  ;;  %v3172_v2 = vpop.eup %3171 }
 0x487   :  { %v3174_v17 = vpop.eup %3173  ;;  %v4555_v53 = vadd.f32 1.0, %v3172_v2 }
 0x488   :  { %3175 = vpow2.f32 %v2444_v32  ;;  %v4559_v33 = vadd.f32 1.0, %v3174_v17 }
 0x489   :  { %v2419_v34 = vpop.f32.mrf.mxu3  ;;  %3177 = vrcp.f32 %v4548_v47  ;;  %vm2519_vm7 = vweird.f32 %v4555_v53 }
 0x48a   :  { %v2420_v6 = vadd.f32 %v2419_v34, %v2363_v9  ;;  %3179 = vrcp.f32 %v4550_v28  ;;  %v2366_v45 = vpop.f32.mrf.mxu2  ;;  %vm2505_vm8 = vweird.f32 %v4559_v33  ;;  %v2509_v2 = vand.u32 2147483647, %v4559_v33 }
 0x48b   :  { %3181 = vrcp.f32 %v4552_v49  ;;  %v2367_v3 = vadd.f32 %v2366_v45, %v2294_v24  ;;  %v2523_v45 = vand.u32 2147483647, %v4555_v53 }
 0x48c   :  { %v2432_v7 = vsub.f32 0.0, %v2420_v6  ;;  %3183 = vrcp.f32 %v4555_v53 }
 0x48e   :  { %v3176_v60 = vpop.eup %3175  ;;  %v2446_v62 = vmul.f32 1.442695, %v2432_v7 }
 0x48f   :  { %v4562_v21 = vadd.f32 1.0, %v3176_v60  ;;  %v4564_v44 = vpop.eup %3177 }
 0x490   :  { %3185 = vpow2.f32 %v2446_v62  ;;  %v4567_v14 = vpop.eup %3179  ;;  %v2459_v27 = vmul.f32 %v4564_v44, %v4548_v47  ;;  %vm2464_vm15 = vweird.f32 %v4564_v44 }
 0x491   :  { %3187 = vrcp.f32 %v4562_v21  ;;  %v2423_v12 = vpop.f32.mrf.mxu3  ;;  %v4570_v11 = vpop.eup %3181  ;;  %v2473_v29 = vmul.f32 %v4567_v14, %v4550_v28  ;;  %vm2478_vm9 = vweird.f32 %v4567_v14  ;;  %vm2533_vm14 = vweird.f32 %v4562_v21 }
 0x492   :  { %3189 = vrcp.f32 %v4559_v33  ;;  %v2424_v35 = vadd.f32 %v2423_v12, %v2367_v3  ;;  %v4574_v23 = vpop.eup %3183  ;;  %v2487_v63 = vmul.f32 %v4570_v11, %v4552_v49  ;;  %v2460_v57 = vsub.f32 1.0, %v2459_v27 }
 0x493   :  { %v2474_v39 = vsub.f32 1.0, %v2473_v29  ;;  %v2515_v40 = vmul.f32 %v4574_v23, %v4555_v53  ;;  %vm2492_vm10 = vweird.f32 %v4570_v11  ;;  %v2539_v7 = vand.u32 2147483648, %v4562_v21 }
 0x494   :  { %v2433_v4 = vsub.f32 0.0, %v2424_v35  ;;  %v2488_v48 = vsub.f32 1.0, %v2487_v63  ;;  %v2461_v31 = vmul.f32 %v4564_v44, %v2460_v57  ;;  %vm2520_vm2 = vweird.f32 %v4574_v23 }
 0x495   :  { %v2475_v25 = vmul.f32 %v4567_v14, %v2474_v39  ;;  %v2516_v1 = vsub.f32 1.0, %v2515_v40  ;;  %v2537_v62 = vand.u32 2147483647, %v4562_v21  ;;  %v2525_v27 = vand.u32 2147483648, %v4555_v53 }
 0x496   :  { %v3186_v61 = vpop.eup %3185  ;;  %v2448_v8 = vmul.f32 1.442695, %v2433_v4  ;;  %v2489_v5 = vmul.f32 %v4570_v11, %v2488_v48  ;;  %v4610_v22 = vadd.f32 %v4564_v44, %v2461_v31 }
 0x497   :  { %v4580_v52 = vpop.eup %3187  ;;  %v4582_v50 = vadd.f32 1.0, %v3186_v61  ;;  %v4620_v20 = vadd.f32 %v4567_v14, %v2475_v25  ;;  %v2517_v38 = vmul.f32 %v4574_v23, %v2516_v1  ;;  %v2526_v40 = vor.u32 1.1754944e-38, %v2525_v27 }
 0x498   :  { %v4584_v15 = vpop.eup %3189  ;;  %v2529_v26 = vmul.f32 %v4580_v52, %v4562_v21  ;;  %3191 = vpow2.f32 %v2448_v8  ;;  %v4625_v9 = vadd.f32 %v4570_v11, %v2489_v5  ;;  %vm2534_vm4 = vweird.f32 %v4580_v52 }
 0x499   :  { %3193 = vrcp.f32 %v4582_v50  ;;  %v2501_v36 = vmul.f32 %v4584_v15, %v4559_v33  ;;  %v2553_v34 = vand.u32 2147483648, %v4582_v50  ;;  %vm2506_vm12 = vweird.f32 %v4584_v15  ;;  %vm4643_vm5 = vmor %vm2533_vm14, %vm2534_vm4 }
 0x49a   :  { %v2530_v55 = vsub.f32 1.0, %v2529_v26  ;;  %v2551_v17 = vand.u32 2147483647, %v4582_v50  ;;  %vm2547_vm1 = vweird.f32 %v4582_v50  ;;  %v2518_v3 = vadd.f32 %v4574_v23, %v2517_v38  ;;  %vm4668_vm14 = vmor %vm2519_vm7, %vm2520_vm2 }
 0x49b   :  { %v2502_v56 = vsub.f32 1.0, %v2501_v36  ;;  %v2554_v35 = vor.u32 1.1754944e-38, %v2553_v34  ;;  %v2540_v8 = vor.u32 1.1754944e-38, %v2539_v7  ;;  %vm4684_vm2 = vmor %vm2505_vm8, %vm2506_vm12  ;;  %vm2496_vm8 = vcmp.eq.f32.partialorder %v2495_v43, 8.507059e+37 }
 0x49c   :  { %v2531_v37 = vmul.f32 %v4580_v52, %v2530_v55  ;;  %vm2552_vm4 = vcmp.eq.f32.partialorder %v2551_v17, 8.507059e+37  ;;  %v2522_v26 = vsel %vm4668_vm14, %v4574_v23, %v2518_v3  ;;  %v2498_v25 = vor.u32 1.1754944e-38, %v2497_v30 }
 0x49d   :  { %v2503_v51 = vmul.f32 %v4584_v15, %v2502_v56  ;;  %v2484_v38 = vor.u32 1.1754944e-38, %v2483_v54  ;;  %v4742_v54 = vsub.f32 %v4590_v10, %v4598_v58 }
 0x49e   :  { %v3192_v59 = vpop.eup %3191  ;;  %v2532_v46 = vadd.f32 %v4580_v52, %v2531_v37 }
 0x49f   :  { %v3194_v41 = vpop.eup %3193  ;;  %v4606_v0 = vadd.f32 1.0, %v3192_v59  ;;  %v2504_v4 = vadd.f32 %v4584_v15, %v2503_v51  ;;  %v2571_v51 = vld [vmem:[#allocation5 + $0x108] sm:$0xff]  ;;  %v2653_v7 = vand.u32 4294901760, %v4742_v54 }
 0x4a0   :  { %v2543_v42 = vmul.f32 %v3194_v41, %v4582_v50  ;;  %vm2548_vm6 = vweird.f32 %v3194_v41  ;;  %v2536_v21 = vsel %vm4643_vm5, %v4580_v52, %v2532_v46  ;;  %v2511_v50 = vand.u32 2147483648, %v4559_v33 }
 0x4a1   :  { %3195 = vrcp.f32 %v4606_v0  ;;  %vm2549_vm3 = vmor %vm2547_vm1, %vm2548_vm6  ;;  %v2567_v13 = vand.u32 2147483648, %v4606_v0  ;;  %v2565_v23 = vand.u32 2147483647, %v4606_v0  ;;  %vm2561_vm12 = vweird.f32 %v4606_v0 }
 0x4a2   :  { %v2544_v32 = vsub.f32 1.0, %v2543_v42  ;;  %vm4662_vm6 = vmor %vm2491_vm13, %vm2492_vm10  ;;  %vm2538_vm13 = vcmp.eq.f32.partialorder %v2537_v62, 8.507059e+37  ;;  %vm2524_vm10 = vcmp.eq.f32.partialorder %v2523_v45, 8.507059e+37  ;;  %v2512_v33 = vor.u32 1.1754944e-38, %v2511_v50 }
 0x4a3   :  { %v2494_v52 = vsel %vm4662_vm6, %v4570_v11, %v4625_v9  ;;  %v2541_v48 = vsel %vm2538_vm13, %v2540_v8, %v2536_v21  ;;  %v2508_v11 = vsel %vm4684_vm2, %v4584_v15, %v2504_v4  ;;  %v2527_v55 = vsel %vm2524_vm10, %v2526_v40, %v2522_v26 }
 0x4a4   :  { %v2545_v6 = vmul.f32 %v3194_v41, %v2544_v32  ;;  %v4696_v1 = vand.u32 4294901760, %v2541_v48  ;;  %vm2510_vm5 = vcmp.eq.f32.partialorder %v2509_v2, 8.507059e+37  ;;  %v2568_v5 = vor.u32 1.1754944e-38, %v2567_v13 }
 0x4a5   :  { %v2499_v56 = vsel %vm2496_vm8, %v2498_v25, %v2494_v52  ;;  %v4713_v43 = vand.u32 4294901760, %v2527_v55  ;;  %v2654_v21 = vsub.f32 %v4742_v54, %v2653_v7  ;;  %v2573_v25 = vld [vmem:[#allocation5 + $0x118] sm:$0xff] }
 0x4a6   :  { %v2546_v60 = vadd.f32 %v3194_v41, %v2545_v6  ;;  %v4734_v9 = vsub.f32 %v2541_v48, %v4696_v1  ;;  %v4744_v6 = vand.u32 4294901760, %v2499_v56 }
 0x4a7   :  { %v3196_v12 = vpop.eup %3195  ;;  %v4754_v28 = vsub.f32 %v2527_v55, %v4713_v43  ;;  %v2655_v13 = vand.u32 4294901760, %v2654_v21 }
 0x4a8   :  { %v2557_v29 = vmul.f32 %v3196_v12, %v4606_v0  ;;  %v2550_v61 = vsel %vm2549_vm3, %v3194_v41, %v2546_v60  ;;  %vm2562_vm1 = vweird.f32 %v3196_v12  ;;  %vm4702_vm3 = vmor %vm2477_vm0, %vm2478_vm9  ;;  %v2513_v41 = vsel %vm2510_vm5, %v2512_v33, %v2508_v11 }
 0x4a9   :  { %v2555_v53 = vsel %vm2552_vm4, %v2554_v35, %v2550_v61  ;;  %vm2563_vm7 = vmor %vm2561_vm12, %vm2562_vm1  ;;  %v2480_v0 = vsel %vm4702_vm3, %v4567_v14, %v4620_v20  ;;  %vm2566_vm4 = vcmp.eq.f32.partialorder %v2565_v23, 8.507059e+37  ;;  %v2470_v20 = vor.u32 1.1754944e-38, %v2469_v19  ;;  %v2572_v61 = vld [vmem:[#allocation5 + $0x110] sm:$0xff] }
 0x4aa   :  { %v2558_v49 = vsub.f32 1.0, %v2557_v29  ;;  %v4693_v31 = vand.u32 4294901760, %v2555_v53  ;;  %vm4719_vm9 = vmor %vm2463_vm11, %vm2464_vm15  ;;  %v4736_v34 = vand.u32 4294901760, %v2513_v41  ;;  %vm2482_vm11 = vcmp.eq.f32.partialorder %v2481_v18, 8.507059e+37 }
 0x4ab   :  { %v2466_v14 = vsel %vm4719_vm9, %v4564_v44, %v4610_v22  ;;  %v2485_v44 = vsel %vm2482_vm11, %v2484_v38, %v2480_v0  ;;  %vm2468_vm0 = vcmp.eq.f32.partialorder %v2467_v16, 8.507059e+37  ;;  %vm4944_vm15 = vcmask 523264  }
 0x4ac   :  { %v2559_v36 = vmul.f32 %v3196_v12, %v2558_v49  ;;  %v4711_v37 = vsub.f32 %v2555_v53, %v4693_v31  ;;  %v2471_v10 = vsel %vm2468_vm0, %v2470_v20, %v2466_v14  ;;  %v2613_v22 = vsel %vm4944_vm15, %v2571_v51, 0  ;;  %vm4945_vm6 = vmmov %vm4944_vm15  ;;  %v2574_v14 = vld [vmem:[#allocation5 + $0x120] sm:$0xff] }
 0x4ad   :  { %v4762_v16 = vsub.f32 %v2513_v41, %v4736_v34  ;;  %v4764_v17 = vand.u32 4294901760, %v2485_v44  ;;  %v2731_v46 = vand.u32 4294901760, %v4734_v9  ;;  %v4770_v45 = vsub.f32 %v2499_v56, %v4744_v6  ;;  %vm4946_vm14 = vmmov %vm4945_vm6 }
 0x4ae   :  { %v2560_v59 = vadd.f32 %v3196_v12, %v2559_v36  ;;  %v2725_v18 = vand.u32 4294901760, %v4711_v37  ;;  %v4772_v60 = vand.u32 4294901760, %v2471_v10  ;;  %v2737_v3 = vand.u32 4294901760, %v4754_v28  ;;  %vm4947_vm13 = vmmov %vm4945_vm6 }
 0x4af   :  { %v2732_v27 = vsub.f32 %v4734_v9, %v2731_v46  ;;  %v4792_v4 = vsub.f32 %v2485_v44, %v4764_v17  ;;  %v2743_v29 = vand.u32 4294901760, %v4762_v16  ;;  %v2749_v57 = vand.u32 4294901760, %v4770_v45  ;;  %vm4948_vm10 = vmmov %vm4945_vm6 }
 0x4b0   :  { %v2564_v42 = vsel %vm2563_vm7, %v3196_v12, %v2560_v59  ;;  %v2726_v62 = vsub.f32 %v4711_v37, %v2725_v18  ;;  %v4783_v12 = vand.u32 4294901760, %v2613_v22  ;;  %v4800_v63 = vsub.f32 %v2471_v10, %v4772_v60  ;;  %v2576_v10 = vld [vmem:[#allocation5 + $0x130] sm:$0xff]  ;;  %vm4949_vm2 = vmmov %vm4945_vm6 }
 0x4b1   :  { %v2569_v32 = vsel %vm2566_vm4, %v2568_v5, %v2564_v42  ;;  %v2738_v8 = vsub.f32 %v4754_v28, %v2737_v3  ;;  %v2615_v52 = vsel %vm4945_vm6, %v2572_v61, 0  ;;  %v2733_v49 = vand.u32 4294901760, %v2732_v27  ;;  %vm4950_vm1 = vmmov %vm4949_vm2 }
 0x4b2   :  { %v4731_v2 = vand.u32 4294901760, %v2569_v32  ;;  %v2727_v53 = vand.u32 4294901760, %v2726_v62  ;;  %v2660_v50 = vsub.f32 %v2613_v22, %v4783_v12  ;;  %v2744_v26 = vsub.f32 %v4762_v16, %v2743_v29 }
 0x4b3   :  { %v2755_v39 = vand.u32 4294901760, %v4792_v4  ;;  %v2761_v48 = vand.u32 4294901760, %v4800_v63  ;;  %v2739_v40 = vand.u32 4294901760, %v2738_v8  ;;  %v2750_v11 = vsub.f32 %v4770_v45, %v2749_v57 }
 0x4b4   :  { %2636 = vmatpush.msra.mxu0 %v4731_v2  ;;  %2866 = vmatpush.msrb.mxu3 %v4731_v2  ;;  %v4751_v19 = vsub.f32 %v2569_v32, %v4731_v2  ;;  %v2661_v36 = vand.u32 4294901760, %v2660_v50  ;;  %v4821_v23 = vand.u32 4294901760, %v2615_v52  ;;  %v2745_v55 = vand.u32 4294901760, %v2744_v26 }
 0x4b5   :  { %v2756_v33 = vsub.f32 %v4792_v4, %v2755_v39  ;;  %v2751_v59 = vand.u32 4294901760, %v2750_v11  ;;  %v2762_v15 = vsub.f32 %v4800_v63, %v2761_v48  ;;  %v2617_v56 = vsel %vm4946_vm14, %v2573_v25, 0 }
 0x4b6   :  { %2638 = vmatpush.msra.mxu0 %v4693_v31  ;;  %2801 = vmatpush.msrb.mxu2 %v4751_v19  ;;  %v2719_v47 = vand.u32 4294901760, %v4751_v19  ;;  %v2662_v5 = vsub.f32 %v2660_v50, %v2661_v36  ;;  %v2667_v41 = vsub.f32 %v2615_v52, %v4821_v23  ;;  %v4840_v38 = vand.u32 4294901760, %v2617_v56 }
 0x4b7   :  { %2868 = vmatpush.msrb.mxu3 %v4693_v31  ;;  %v2757_v0 = vand.u32 4294901760, %v2756_v33  ;;  %v2763_v42 = vand.u32 4294901760, %v2762_v15  ;;  %v2619_v51 = vsel %vm4947_vm13, %v2574_v14, 0 }
 0x4b8   :  { %2640 = vmatpush.msra.mxu0 %v4696_v1  ;;  %2804 = vmatpush.msrb.mxu2 %v4711_v37  ;;  %v2720_v24 = vsub.f32 %v4751_v19, %v2719_v47  ;;  %v2663_v30 = vand.u32 4294901760, %v2662_v5  ;;  %v2668_v32 = vand.u32 4294901760, %v2667_v41  ;;  %v2674_v20 = vsub.f32 %v2617_v56, %v4840_v38 }
 0x4b9   :  { %2870 = vmatpush.msrb.mxu3 %v4696_v1  ;;  %v4854_v44 = vand.u32 4294901760, %v2619_v51 }
 0x4ba   :  { %2642 = vmatpush.msra.mxu0 %v4713_v43  ;;  %2807 = vmatpush.msrb.mxu2 %v4734_v9  ;;  %v2721_v35 = vand.u32 4294901760, %v2720_v24  ;;  %v2669_v37 = vsub.f32 %v2667_v41, %v2668_v32 }
 0x4bb   :  { %2872 = vmatpush.msrb.mxu3 %v4713_v43  ;;  %v2681_v19 = vsub.f32 %v2619_v51, %v4854_v44 }
 0x4bc   :  { %2644 = vmatpush.msra.mxu0 %v4736_v34  ;;  %2722 = vmatpush.msra.mxu1 %v2721_v35  ;;  %v2670_v9 = vand.u32 4294901760, %v2669_v37 }
 0x4bd   :  { %2810 = vmatpush.msrb.mxu2 %v4754_v28  ;;  %2874 = vmatpush.msrb.mxu3 %v4736_v34 }
 0x4be   :  { %2646 = vmatpush.msra.mxu0 %v4744_v6  ;;  %2728 = vmatpush.msra.mxu1 %v2727_v53 }
 0x4bf   :  { %2813 = vmatpush.msrb.mxu2 %v4762_v16  ;;  %2876 = vmatpush.msrb.mxu3 %v4744_v6 }
 0x4c0   :  { %2648 = vmatpush.msra.mxu0 %v4764_v17  ;;  %2734 = vmatpush.msra.mxu1 %v2733_v49 }
 0x4c1   :  { %2816 = vmatpush.msrb.mxu2 %v4770_v45  ;;  %2878 = vmatpush.msrb.mxu3 %v4764_v17 }
 0x4c2   :  { %2650 = vmatpush.msra.mxu0 %v4772_v60  ;;  %2740 = vmatpush.msra.mxu1 %v2739_v40 }
 0x4c3   :  { %2819 = vmatpush.msrb.mxu2 %v4792_v4  ;;  %2880 = vmatpush.msrb.mxu3 %v4772_v60 }
 0x4c4   :  { %2656 = vmatmul.f32.vlgmr.msra.gmra.mxu0 %v2655_v13  ;;  %2746 = vmatpush.msra.mxu1 %v2745_v55 }
 0x4c5   :  { %2934 = vmatpush.msrb.mxu0 %v2719_v47  ;;  %2822 = vmatpush.msrb.mxu2 %v4800_v63  ;;  %v2623_v47 = vsel %vm4949_vm2, %v2576_v10, 0 }
 0x4c6   :  { %2752 = vmatpush.msra.mxu1 %v2751_v59  ;;  %2825 = vmatmul.f32.vlgmr.msrb.gmra.mxu2 %v4742_v54  ;;  %v2675_v54 = vand.u32 4294901760, %v2674_v20 }
 0x4c7   :  { %2938 = vmatpush.msrb.mxu0 %v2725_v18  ;;  %2884 = vmatmul.f32.vlgmr.msrb.gmra.mxu3 %v2653_v7  ;;  %v2577_v7 = vld [vmem:[#allocation5 + $0x138] sm:$0xff] }
 0x4c8   :  { %2758 = vmatpush.msra.mxu1 %v2757_v0 }
 0x4c9   :  { %2942 = vmatpush.msrb.mxu0 %v2731_v46  ;;  %v2694_v46 = vand.u32 4294901760, %v2623_v47 }
 0x4ca   :  { %2764 = vmatpush.msra.mxu1 %v2763_v42 }
 0x4cb   :  { %2946 = vmatpush.msrb.mxu0 %v2737_v3  ;;  %2766 = vmatmul.f32.vlgmr.msra.gmra.mxu1 %v4598_v58  ;;  %v2695_v45 = vsub.f32 %v2623_v47, %v2694_v46 }
 0x4cc   :  { %2664 = vmatmul.f32.gmra.mxu0 %v2663_v30  ;;  %2998 = vmatpush.msrb.mxu1 %v4731_v2  ;;  %v2575_v2 = vld [vmem:[#allocation5 + $0x128] sm:$0xff] }
 0x4cd   :  { %2950 = vmatpush.msrb.mxu0 %v2743_v29  ;;  %v2621_v28 = vsel %vm4948_vm10, %v2575_v2, 0  ;;  %v2696_v62 = vand.u32 4294901760, %v2695_v45 }
 0x4ce   :  { %3000 = vmatpush.msrb.mxu1 %v4693_v31  ;;  %2830 = vmatmul.f32.gmra.mxu2 %v2660_v50  ;;  %v2676_v31 = vsub.f32 %v2674_v20, %v2675_v54  ;;  %v2687_v18 = vand.u32 4294901760, %v2621_v28 }
 0x4cf   :  { %2954 = vmatpush.msrb.mxu0 %v2749_v57  ;;  %2890 = vmatmul.f32.gmra.mxu3 %v2661_v36  ;;  %v2697_v35 = vsub.f32 %v2695_v45, %v2696_v62 }
 0x4d0   :  { %3002 = vmatpush.msrb.mxu1 %v4696_v1  ;;  %v2677_v1 = vand.u32 4294901760, %v2676_v31  ;;  %v2688_v22 = vsub.f32 %v2621_v28, %v2687_v18 }
 0x4d1   :  { %2958 = vmatpush.msrb.mxu0 %v2755_v39  ;;  %v2698_v4 = vand.u32 4294901760, %v2697_v35 }
 0x4d2   :  { %3004 = vmatpush.msrb.mxu1 %v4713_v43  ;;  %v2682_v43 = vand.u32 4294901760, %v2681_v19  ;;  %v2689_v16 = vand.u32 4294901760, %v2688_v22 }
 0x4d3   :  { %2962 = vmatpush.msrb.mxu0 %v2761_v48  ;;  %2770 = vmatmul.f32.gmra.mxu1 %v4783_v12 }
 0x4d4   :  { %2671 = vmatmul.f32.gmra.mxu0 %v2670_v9  ;;  %3006 = vmatpush.msrb.mxu1 %v4736_v34  ;;  %v2683_v34 = vsub.f32 %v2681_v19, %v2682_v43 }
 0x4d6   :  { %3008 = vmatpush.msrb.mxu1 %v4744_v6  ;;  %2834 = vmatmul.f32.gmra.mxu2 %v2667_v41  ;;  %v2684_v6 = vand.u32 4294901760, %v2683_v34 }
 0x4d7   :  { %2895 = vmatmul.f32.gmra.mxu3 %v2668_v32  ;;  %v2581_v32 = vpop.permute.xlu0 %2580 }
 0x4d8   :  { %3010 = vmatpush.msrb.mxu1 %v4764_v17  ;;  %v2690_v17 = vsub.f32 %v2688_v22, %v2689_v16 }
 0x4da   :  { %3012 = vmatpush.msrb.mxu1 %v4772_v60  ;;  %v2625_v60 = vsel %vm4950_vm1, %v2577_v7, 0  ;;  %v2691_v24 = vand.u32 4294901760, %v2690_v17 }
 0x4db   :  { %2773 = vmatmul.f32.gmra.mxu1 %v4821_v23  ;;  %v2701_v3 = vand.u32 4294901760, %v2625_v60 }
 0x4dc   :  { %2678 = vmatmul.f32.gmra.mxu0 %v2677_v1 }
 0x4dd   :  { %v2702_v27 = vsub.f32 %v2625_v60, %v2701_v3 }
 0x4de   :  { %2838 = vmatmul.f32.gmra.mxu2 %v2674_v20 }
 0x4df   :  { %2900 = vmatmul.f32.gmra.mxu3 %v2675_v54  ;;  %v2703_v29 = vand.u32 4294901760, %v2702_v27 }
 0x4e1   :  { %v2704_v61 = vsub.f32 %v2702_v27, %v2703_v29 }
 0x4e3   :  { %2776 = vmatmul.f32.gmra.mxu1 %v4840_v38  ;;  %v2705_v21 = vand.u32 4294901760, %v2704_v61 }
 0x4e4   :  { %2685 = vmatmul.f32.gmra.mxu0 %v2684_v6 }
 0x4e6   :  { %2842 = vmatmul.f32.gmra.mxu2 %v2681_v19 }
 0x4e7   :  { %2905 = vmatmul.f32.gmra.mxu3 %v2682_v43 }
 0x4eb   :  { %2779 = vmatmul.f32.gmra.mxu1 %v4854_v44 }
 0x4ec   :  { %2692 = vmatmul.f32.gmra.mxu0 %v2691_v24 }
 0x4ee   :  { %2846 = vmatmul.f32.gmra.mxu2 %v2688_v22 }
 0x4ef   :  { %2910 = vmatmul.f32.gmra.mxu3 %v2689_v16 }
 0x4f3   :  { %2782 = vmatmul.f32.gmra.mxu1 %v2687_v18 }
 0x4f4   :  { %2699 = vmatmul.f32.gmra.mxu0 %v2698_v4 }
 0x4f6   :  { %2850 = vmatmul.f32.gmra.mxu2 %v2695_v45 }
 0x4f7   :  { %2915 = vmatmul.f32.gmra.mxu3 %v2696_v62 }
 0x4fb   :  { %2785 = vmatmul.f32.gmra.mxu1 %v2694_v46 }
 0x4fc   :  { %2706 = vmatmul.f32.gmra.mxu0 %v2705_v21 }
 0x4fe   :  { %2854 = vmatmul.f32.gmra.mxu2 %v2702_v27 }
 0x4ff   :  { %2920 = vmatmul.f32.gmra.mxu3 %v2703_v29 }
 0x503   :  { %2788 = vmatmul.f32.gmra.mxu1 %v2701_v3 }
 0x504   :  { %2964 = vmatmul.f32.vlgmr.msrb.gmra.mxu0 %v4598_v58 }
 0x50b   :  { %3014 = vmatmul.f32.vlgmr.msrb.gmra.mxu1 %v4598_v58 }
 0x50c   :  { %2968 = vmatmul.f32.gmra.mxu0 %v4783_v12 }
 0x513   :  { %3018 = vmatmul.f32.gmra.mxu1 %v4783_v12 }
 0x514   :  { %2971 = vmatmul.f32.gmra.mxu0 %v4821_v23 }
 0x51b   :  { %3021 = vmatmul.f32.gmra.mxu1 %v4821_v23 }
 0x51c   :  { %2974 = vmatmul.f32.gmra.mxu0 %v4840_v38 }
 0x523   :  { %3024 = vmatmul.f32.gmra.mxu1 %v4840_v38 }
 0x524   :  { %2977 = vmatmul.f32.gmra.mxu0 %v4854_v44 }
 0x52b   :  { %3027 = vmatmul.f32.gmra.mxu1 %v4854_v44 }
 0x52c   :  { %2980 = vmatmul.f32.gmra.mxu0 %v2687_v18 }
 0x533   :  { %3030 = vmatmul.f32.gmra.mxu1 %v2687_v18 }
 0x534   :  { %2983 = vmatmul.f32.gmra.mxu0 %v2694_v46 }
 0x53b   :  { %3033 = vmatmul.f32.gmra.mxu1 %v2694_v46 }
 0x53c   :  { %2986 = vmatmul.f32.gmra.mxu0 %v2701_v3 }
 0x541   :  { %v2657_v58 = vpop.f32.mrf.mxu0 }
 0x542   :  { %v2658_v14 = vadd.f32 %v2657_v58, %v2581_v32 }
 0x543   :  { %3036 = vmatmul.f32.gmra.mxu1 %v2701_v3 }
 0x548   :  { %v2767_v12 = vpop.f32.mrf.mxu1 }
 0x549   :  { %v2665_v63 = vpop.f32.mrf.mxu0  ;;  %v2826_v53 = vpop.f32.mrf.mxu2  ;;  %v2768_v37 = vadd.f32 %v2767_v12, %v2658_v14 }
 0x54a   :  { %v2885_v8 = vpop.f32.mrf.mxu3 }
 0x54b   :  { %v2827_v51 = vadd.f32 %v2826_v53, %v2768_v37 }
 0x54d   :  { %v2886_v2 = vadd.f32 %v2885_v8, %v2827_v51 }
 0x550   :  { %v2771_v57 = vpop.f32.mrf.mxu1 }
 0x551   :  { %v2672_v50 = vpop.f32.mrf.mxu0  ;;  %v2831_v52 = vpop.f32.mrf.mxu2 }
 0x552   :  { %v2891_v49 = vpop.f32.mrf.mxu3 }
 0x558   :  { %v2774_v26 = vpop.f32.mrf.mxu1 }
 0x559   :  { %v2679_v39 = vpop.f32.mrf.mxu0  ;;  %v2835_v13 = vpop.f32.mrf.mxu2 }
 0x55a   :  { %v2896_v48 = vpop.f32.mrf.mxu3 }
 0x560   :  { %v2777_v40 = vpop.f32.mrf.mxu1 }
 0x561   :  { %v2686_v11 = vpop.f32.mrf.mxu0  ;;  %v2839_v36 = vpop.f32.mrf.mxu2 }
 0x562   :  { %v2901_v23 = vpop.f32.mrf.mxu3 }
 0x568   :  { %v2780_v55 = vpop.f32.mrf.mxu1 }
 0x569   :  { %v2693_v33 = vpop.f32.mrf.mxu0  ;;  %v2843_v25 = vpop.f32.mrf.mxu2 }
 0x56a   :  { %v2906_v59 = vpop.f32.mrf.mxu3 }
 0x570   :  { %v2783_v15 = vpop.f32.mrf.mxu1 }
 0x571   :  { %v2700_v5 = vpop.f32.mrf.mxu0  ;;  %v2847_v41 = vpop.f32.mrf.mxu2 }
 0x572   :  { %v2911_v56 = vpop.f32.mrf.mxu3 }
 0x578   :  { %v2786_v0 = vpop.f32.mrf.mxu1 }
 0x579   :  { %v2707_v42 = vpop.f32.mrf.mxu0  ;;  %v2851_v30 = vpop.f32.mrf.mxu2 }
 0x57a   :  { %v2916_v38 = vpop.f32.mrf.mxu3 }
 0x580   :  { %v2789_v20 = vpop.f32.mrf.mxu1 }
 0x581   :  { %v2965_v9 = vpop.f32.mrf.mxu0  ;;  %v2855_v54 = vpop.f32.mrf.mxu2 }
 0x582   :  { %v2921_v44 = vpop.f32.mrf.mxu3  ;;  %v2966_v31 = vadd.f32 %v2965_v9, %v2886_v2 }
 0x588   :  { %v3015_v19 = vpop.f32.mrf.mxu1 }
 0x589   :  { %v3016_v28 = vadd.f32 %v3015_v19, %v2966_v31  ;;  %v2969_v1 = vpop.f32.mrf.mxu0 }
 0x58b   :  { %3039 = vst [vmem:[#allocation7] sm:$0x3] %v3016_v28 }
 0x58c   :  { %3050 = dma.vmem_to_hbm [thread:$0]  %s3046_s1, 32, %s3048_s23, [#allocation4]  }
 0x590   :  { %v3019_v43 = vpop.f32.mrf.mxu1 }
 0x591   :  { %v2972_v18 = vpop.f32.mrf.mxu0 }
 0x598   :  { %v3022_v10 = vpop.f32.mrf.mxu1 }
 0x599   :  { %v2975_v34 = vpop.f32.mrf.mxu0 }
 0x5a0   :  { %v3025_v22 = vpop.f32.mrf.mxu1 }
 0x5a1   :  { %v2978_v47 = vpop.f32.mrf.mxu0 }
 0x5a8   :  { %v3028_v6 = vpop.f32.mrf.mxu1 }
 0x5a9   :  { %v2981_v16 = vpop.f32.mrf.mxu0 }
 0x5b0   :  { %v3031_v46 = vpop.f32.mrf.mxu1 }
 0x5b1   :  { %v2984_v7 = vpop.f32.mrf.mxu0 }
 0x5b8   :  { %v3034_v17 = vpop.f32.mrf.mxu1 }
 0x5b9   :  { %v2987_v45 = vpop.f32.mrf.mxu0 }
 0x5c0   :  { %v3037_v60 = vpop.f32.mrf.mxu1 }
 0x5c1   :  { %3282 = dma.done.wait [#allocation4], 32  }
 0x5c2   :  { %3283 = vsyncadd [#allocation4], 4294967264 }
 0x5c3   :  { %3055 = vsyncpa [#allocation3], 1 }
 0x5c4   :  { %3056 = vsyncpa [#allocation6], 1 }
 0x5c5   :  { %3057 = vsyncpa [#allocation4], 1 }

</bundles_post_ra>
